<compile_context>
chip_gen: v6e
topology: v6e:2x2x1
jax: 0.10.0
libtpu: 0.0.40
codegen_flags: <defaults>
</compile_context>

<pallas_src>
import math

import jax
import jax.numpy as jnp
from jax.experimental import pallas as pl
from jax.experimental.pallas import tpu as pltpu

EMBED = 32          # embed_size
HEADS = 4           # heads
HEAD_DIM = EMBED // HEADS
FWD_EXP = 4         # forward_expansion
HIDDEN = FWD_EXP * EMBED

_INV_SQRT_E = 1.0 / math.sqrt(EMBED)


# ---------------------------------------------------------------------------
# In-kernel helpers
# ---------------------------------------------------------------------------
def _layernorm(x, gamma, beta, eps):
    mu = jnp.mean(x, axis=-1, keepdims=True)
    var = jnp.mean((x - mu) ** 2, axis=-1, keepdims=True)
    return (x - mu) * jax.lax.rsqrt(var + eps) * gamma + beta


# ---------------------------------------------------------------------------
# Pallas kernel: NB batch elements per grid step
# ---------------------------------------------------------------------------
def decoder_block_kernel(x_ref, val_ref, key_ref, tb_ref, sb_ref,
                         w_ref, wf2_ref, vec_ref, out_ref):
    nb, s, e = x_ref.shape
    m = nb * s

    W = w_ref[...]                        # (3E, 4E) packed matmul weights
    wf2t = wf2_ref[...]                   # (HIDDEN, E)
    V = vec_ref[...].astype(jnp.float32)  # (10, HIDDEN) packed vectors
    cdt = W.dtype                         # MXU operand dtype (f32 or bf16)

    w_att1 = W[0:EMBED, :]                # [Wq_bd | Wk_bd | Wv_bd | Wo^T] self-attn
    w_att2 = W[EMBED:2 * EMBED, :]        # same layout, cross-attn
    wf1t = W[2 * EMBED:3 * EMBED, :]      # (E, HIDDEN)

    bf1 = V[0:1, :]                       # (1, HIDDEN)
    bo1 = V[1:2, :EMBED]
    gn = V[2:3, :EMBED]
    bn = V[3:4, :EMBED]
    bo2 = V[4:5, :EMBED]
    g1 = V[5:6, :EMBED]
    b1 = V[6:7, :EMBED]
    g2 = V[7:8, :EMBED]
    b2 = V[8:9, :EMBED]
    bf2 = V[9:10, :EMBED]

    x = x_ref[...].astype(jnp.float32).reshape(m, e)
    value = val_ref[...].astype(jnp.float32).reshape(m, e)
    key = key_ref[...].astype(jnp.float32).reshape(m, e)
    trg_bias = tb_ref[...]                # (nb, s, s) additive, 0 / -1e20
    src_bias = sb_ref[...]                # (nb, 1, s) additive, 0 / -1e20

    def attention(q_in, k_in, v_in, bias, w, bo, fused_qkv):
        """q_in/k_in/v_in: (m, E) f32; bias broadcastable to (nb, s, s);
        w: (E, 4E) = [Wq_bd | Wk_bd | Wv_bd | Wo^T]; bo: (1, E)."""
        if fused_qkv:   # self-attention: single full-width projection matmul
            proj = jnp.dot(q_in.astype(cdt), w, preferred_element_type=jnp.float32)
            q_all = proj[:, 0:EMBED]
            k_all = proj[:, EMBED:2 * EMBED]
            v_all = proj[:, 2 * EMBED:3 * EMBED]
        else:           # cross-attention: q/k/v come from different tensors
            q_all = jnp.dot(q_in.astype(cdt), w[:, 0:EMBED],
                            preferred_element_type=jnp.float32)
            k_all = jnp.dot(k_in.astype(cdt), w[:, EMBED:2 * EMBED],
                            preferred_element_type=jnp.float32)
            v_all = jnp.dot(v_in.astype(cdt), w[:, 2 * EMBED:3 * EMBED],
                            preferred_element_type=jnp.float32)

        ctx_parts = []
        for h in range(HEADS):  # static unroll; each iteration batched over nb
            lo, hi = h * HEAD_DIM, (h + 1) * HEAD_DIM
            qh = q_all[:, lo:hi].reshape(nb, s, HEAD_DIM)
            kh = k_all[:, lo:hi].reshape(nb, s, HEAD_DIM)
            vh = v_all[:, lo:hi].reshape(nb, s, HEAD_DIM)
            energy = jnp.einsum('bqd,bkd->bqk', qh.astype(cdt), kh.astype(cdt),
                                preferred_element_type=jnp.float32)     # (nb,s,s)
            energy = energy + bias           # additive mask bias (0 / -1e20)
            energy = jnp.clip(energy, -1e6, 1e6)
            logits = energy * _INV_SQRT_E
            logits = logits - jnp.max(logits, axis=-1, keepdims=True)
            p = jnp.exp(logits)
            attn = p / jnp.sum(p, axis=-1, keepdims=True)
            ctx = jnp.einsum('bqk,bkd->bqd', attn.astype(cdt), vh.astype(cdt),
                             preferred_element_type=jnp.float32)        # (nb,s,D)
            ctx_parts.append(ctx.reshape(m, HEAD_DIM))
        ctx_all = jnp.concatenate(ctx_parts, axis=1)                    # (m, E)
        return jnp.dot(ctx_all.astype(cdt), w[:, 3 * EMBED:4 * EMBED],
                       preferred_element_type=jnp.float32) + bo

    # --- DecoderBlock: masked self-attention(x, x, x, trg_mask) ---
    attn1 = attention(x, x, x, trg_bias, w_att1, bo1, fused_qkv=True)
    # dropout == identity; nn.LayerNorm default eps = 1e-5
    query = _layernorm(attn1 + x, gn, bn, 1e-5)

    # --- TransformerBlock.  PyTorch argument order: the block calls
    #     SelfAttention(queries=value, keys=key, values=query, mask=src_mask)
    attn2 = attention(value, key, query, src_bias, w_att2, bo2, fused_qkv=False)
    h = jnp.clip(attn2 + query, -1e6, 1e6)
    h = _layernorm(h, g1, b1, 1e-6)

    ff = jnp.dot(h.astype(cdt), wf1t, preferred_element_type=jnp.float32) + bf1
    ff = jnp.maximum(ff, 0.0)
    ff = jnp.dot(ff.astype(cdt), wf2t, preferred_element_type=jnp.float32) + bf2
    out = _layernorm(ff + h, g2, b2, 1e-6)
    out_ref[...] = out.reshape(nb, s, e).astype(out_ref.dtype)


# ---------------------------------------------------------------------------
# Wrapper: parameter packing (glue) + pallas_call
# ---------------------------------------------------------------------------
def _block_diag(w):
    """(D, D) PyTorch Linear weight -> (E, E) block-diagonal of w.T, so that
    (x @ W_bd)[:, hD:(h+1)D] == x[:, hD:(h+1)D] @ w.T."""
    wt = w.T.astype(jnp.float32)
    out = jnp.zeros((EMBED, EMBED), jnp.float32)
    for h in range(HEADS):
        sl = slice(h * HEAD_DIM, (h + 1) * HEAD_DIM)
        out = out.at[sl, sl].set(wt)
    return out


def _attn_slab(wq, wk, wv, wo):
    return jnp.concatenate(
        [_block_diag(wq), _block_diag(wk), _block_diag(wv),
         wo.T.astype(jnp.float32)], axis=1)                  # (E, 4E)


def _mask_to_bias(mask, n, sk):
    """Boolean 'keep' mask (broadcastable over heads) -> additive bias
    (n, sq, sk) with 0 where kept and -1e20 where masked."""
    m = jnp.asarray(mask)
    sq = m.shape[-2] if m.ndim >= 2 else 1
    m = jnp.broadcast_to(m.astype(bool), (n, 1, sq, sk))
    return jnp.where(m, jnp.float32(0.0), jnp.float32(-1e20)).reshape(n, sq, sk)


def _pad_row(v):
    return jnp.zeros((HIDDEN,), jnp.float32).at[:v.shape[0]].set(
        v.astype(jnp.float32))


def _pick_block_batch(n):
    """Batch elements per grid step: amortize per-step overhead but keep
    >= 2 grid steps so both v7x TensorCores get work."""
    if n <= 1:
        return 1
    for nb in (16, 8, 4, 2):
        if n % nb == 0 and n // nb >= 2:
            return nb
    return 1


def decoder_block(x, value, key, trg_mask, src_mask, params, *,
                  mxu_dtype=jnp.float32):
    N, S, E = x.shape
    assert E == EMBED
    assert value.shape == x.shape and key.shape == x.shape

    NB = _pick_block_batch(N)
    grid = (N // NB,)

    x = x.astype(jnp.float32)
    value = value.astype(jnp.float32)
    key = key.astype(jnp.float32)

    trg_bias = _mask_to_bias(trg_mask, N, S)   # (N, S, S) or (N, 1, S)
    src_bias = _mask_to_bias(src_mask, N, S)

    p = params
    w_big = jnp.concatenate(
        [_attn_slab(p['wq1'], p['wk1'], p['wv1'], p['wo1']),
         _attn_slab(p['wq2'], p['wk2'], p['wv2'], p['wo2']),
         p['wf1'].T.astype(jnp.float32)], axis=0).astype(mxu_dtype)  # (3E, 4E)
    wf2t = p['wf2'].T.astype(mxu_dtype)                              # (HIDDEN, E)
    vecs = jnp.stack(
        [p['bf1'].astype(jnp.float32),
         _pad_row(p['bo1']), _pad_row(p['gn']), _pad_row(p['bn']),
         _pad_row(p['bo2']), _pad_row(p['g1']), _pad_row(p['b1']),
         _pad_row(p['g2']), _pad_row(p['b2']), _pad_row(p['bf2'])],
        axis=0)                                                      # (10, HIDDEN)

    seq_spec = pl.BlockSpec((NB, S, E), lambda b: (b, 0, 0))
    tb_spec = pl.BlockSpec((NB,) + trg_bias.shape[1:], lambda b: (b, 0, 0))
    sb_spec = pl.BlockSpec((NB,) + src_bias.shape[1:], lambda b: (b, 0, 0))

    def full_spec(a):
        nd = a.ndim
        return pl.BlockSpec(a.shape, lambda b, nd=nd: (0,) * nd)

    return pl.pallas_call(
        decoder_block_kernel,
        out_shape=jax.ShapeDtypeStruct((N, S, E), jnp.float32),
        grid_spec=pltpu.PrefetchScalarGridSpec(
            num_scalar_prefetch=0,
            grid=grid,
            in_specs=[seq_spec, seq_spec, seq_spec, tb_spec, sb_spec,
                      full_spec(w_big), full_spec(wf2t), full_spec(vecs)],
            out_specs=seq_spec),
        compiler_params=pltpu.CompilerParams(
            dimension_semantics=("parallel",)),
    )(x, value, key, trg_bias, src_bias, w_big, wf2t, vecs)


# ---------------------------------------------------------------------------
# Deterministic parameter init (PyTorch module shapes)
# ---------------------------------------------------------------------------
def init_params(key):
    ks = jax.random.split(key, 16)
    lin = lambda k, o, i: jax.random.normal(k, (o, i), jnp.float32) * 0.1
    vec = lambda k, n: jax.random.normal(k, (n,), jnp.float32) * 0.1
    return {
        # DecoderBlock.attention
        'wq1': lin(ks[0], HEAD_DIM, HEAD_DIM), 'wk1': lin(ks[1], HEAD_DIM, HEAD_DIM),
        'wv1': lin(ks[2], HEAD_DIM, HEAD_DIM), 'wo1': lin(ks[3], EMBED, EMBED),
        'bo1': vec(ks[4], EMBED),
        # DecoderBlock.norm (eps=1e-5)
        'gn': jnp.ones((EMBED,), jnp.float32), 'bn': jnp.zeros((EMBED,), jnp.float32),
        # TransformerBlock.attention
        'wq2': lin(ks[5], HEAD_DIM, HEAD_DIM), 'wk2': lin(ks[6], HEAD_DIM, HEAD_DIM),
        'wv2': lin(ks[7], HEAD_DIM, HEAD_DIM), 'wo2': lin(ks[8], EMBED, EMBED),
        'bo2': vec(ks[9], EMBED),
        # TransformerBlock.norm1 / norm2 (eps=1e-6)
        'g1': jnp.ones((EMBED,), jnp.float32), 'b1': jnp.zeros((EMBED,), jnp.float32),
        'g2': jnp.ones((EMBED,), jnp.float32), 'b2': jnp.zeros((EMBED,), jnp.float32),
        # feedforward
        'wf1': lin(ks[10], HIDDEN, EMBED), 'bf1': vec(ks[11], HIDDEN),
        'wf2': lin(ks[12], EMBED, HIDDEN), 'bf2': vec(ks[13], EMBED),
    }


# ---------------------------------------------------------------------------
# Pure-JAX reference mirroring the PyTorch forward exactly
# ---------------------------------------------------------------------------
def reference(x, value, key_, trg_mask, src_mask, p):
    def ln(t, g, b, eps):
        mu = t.mean(-1, keepdims=True)
        var = ((t - mu) ** 2).mean(-1, keepdims=True)
        return (t - mu) / jnp.sqrt(var + eps) * g + b

    def self_attn(queries, keys, values, mask, wq, wk, wv, wo, bo):
        N = queries.shape[0]
        vl, kl, ql = values.shape[1], keys.shape[1], queries.shape[1]
        v = values.reshape(N, vl, HEADS, HEAD_DIM) @ wv.T
        k = keys.reshape(N, kl, HEADS, HEAD_DIM) @ wk.T
        q = queries.reshape(N, ql, HEADS, HEAD_DIM) @ wq.T
        energy = jnp.einsum('nqhd,nkhd->nhqk', q, k)
        energy = jnp.where(mask, energy, -1e20)
        energy = jnp.clip(energy, -1e6, 1e6)
        a = jax.nn.softmax(energy / (EMBED ** 0.5), axis=3)
        out = jnp.einsum('nhql,nlhd->nqhd', a, v).reshape(N, ql, EMBED)
        return out @ wo.T + bo

    attn1 = self_attn(x, x, x, trg_mask,
                      p['wq1'], p['wk1'], p['wv1'], p['wo1'], p['bo1'])
    query = ln(attn1 + x, p['gn'], p['bn'], 1e-5)
    attn2 = self_attn(value, key_, query, src_mask,
                      p['wq2'], p['wk2'], p['wv2'], p['wo2'], p['bo2'])
    h = jnp.clip(attn2 + query, -1e6, 1e6)
    h = ln(h, p['g1'], p['b1'], 1e-6)
    ff = jnp.maximum(h @ p['wf1'].T + p['bf1'], 0.0) @ p['wf2'].T + p['bf2']
    return ln(ff + h, p['g2'], p['b2'], 1e-6)


if __name__ == "__main__":
    N, S = 2, 8
    root = jax.random.PRNGKey(0)
    k1, k2, k3, kp = jax.random.split(root, 4)
    x = jax.random.normal(k1, (N, S, EMBED), jnp.float32)
    value = jax.random.normal(k2, (N, S, EMBED), jnp.float32)
    enc_key = jax.random.normal(k3, (N, S, EMBED), jnp.float32)

    # causal target mask, padding-style source mask (last key masked in batch 1)
    trg_mask = jnp.broadcast_to(
        jnp.tril(jnp.ones((S, S), jnp.bool_))[None, None], (N, 1, S, S))
    src_mask = jnp.ones((N, 1, 1, S), jnp.bool_).at[1, 0, 0, S - 1].set(False)

    params = init_params(kp)

    out = decoder_block(x, value, enc_key, trg_mask, src_mask, params)
    out = jax.block_until_ready(out)

    ref = reference(x, value, enc_key, trg_mask, src_mask, params)
    assert out.shape == (N, S, EMBED)
    max_err = float(jnp.max(jnp.abs(out - ref)))
    assert jnp.allclose(out, ref, atol=1e-3, rtol=1e-3), max_err
    print("KERNEL_OK")
</pallas_src>

<mosaic_0001>
module attributes {stable_mosaic.version = 11 : i64} {
  func.func @decoder_block_kernel(%arg0: i32, %arg1: memref<1x8x32xf32, #tpu.memory_space<vmem>>, %arg2: memref<1x8x32xf32, #tpu.memory_space<vmem>>, %arg3: memref<1x8x32xf32, #tpu.memory_space<vmem>>, %arg4: memref<1x8x8xf32, #tpu.memory_space<vmem>>, %arg5: memref<1x1x8xf32, #tpu.memory_space<vmem>>, %arg6: memref<96x128xf32, #tpu.memory_space<vmem>>, %arg7: memref<128x32xf32, #tpu.memory_space<vmem>>, %arg8: memref<10x128xf32, #tpu.memory_space<vmem>>, %arg9: memref<1x8x32xf32, #tpu.memory_space<vmem>>) attributes {dimension_semantics = [#tpu.dimension_semantics<parallel>], iteration_bounds = array<i64: 2>, scalar_prefetch = 0 : i64, scratch_operands = 0 : i64, tpu.core_type = #tpu.core_type<tc>, window_params = [{transform_indices = @transform_0, window_bounds = array<i64: 1, 8, 32>}, {transform_indices = @transform_1, window_bounds = array<i64: 1, 8, 32>}, {transform_indices = @transform_2, window_bounds = array<i64: 1, 8, 32>}, {transform_indices = @transform_3, window_bounds = array<i64: 1, 8, 8>}, {transform_indices = @transform_4, window_bounds = array<i64: 1, 1, 8>}, {pipeline_mode = #tpu.pipeline_mode<synchronous>, transform_indices = @transform_5, window_bounds = array<i64: 96, 128>}, {pipeline_mode = #tpu.pipeline_mode<synchronous>, transform_indices = @transform_6, window_bounds = array<i64: 128, 32>}, {pipeline_mode = #tpu.pipeline_mode<synchronous>, transform_indices = @transform_7, window_bounds = array<i64: 10, 128>}, {transform_indices = @transform_8, window_bounds = array<i64: 1, 8, 32>}]} {
    %c0 = arith.constant 0 : index
    %c0_0 = arith.constant 0 : index
    %0 = vector.load %arg6[%c0, %c0_0] : memref<96x128xf32, #tpu.memory_space<vmem>>, vector<96x128xf32>
    %c0_1 = arith.constant 0 : index
    %c0_2 = arith.constant 0 : index
    %1 = vector.load %arg7[%c0_1, %c0_2] : memref<128x32xf32, #tpu.memory_space<vmem>>, vector<128x32xf32>
    %c0_3 = arith.constant 0 : index
    %c0_4 = arith.constant 0 : index
    %2 = vector.load %arg8[%c0_3, %c0_4] : memref<10x128xf32, #tpu.memory_space<vmem>>, vector<10x128xf32>
    %3 = vector.extract_strided_slice %0 {offsets = [0, 0], sizes = [32, 128], strides = [1, 1]} : vector<96x128xf32> to vector<32x128xf32>
    %4 = vector.extract_strided_slice %0 {offsets = [32, 0], sizes = [32, 128], strides = [1, 1]} : vector<96x128xf32> to vector<32x128xf32>
    %5 = vector.extract_strided_slice %0 {offsets = [64, 0], sizes = [32, 128], strides = [1, 1]} : vector<96x128xf32> to vector<32x128xf32>
    %6 = vector.extract_strided_slice %2 {offsets = [0, 0], sizes = [1, 128], strides = [1, 1]} : vector<10x128xf32> to vector<1x128xf32>
    %7 = vector.extract_strided_slice %2 {offsets = [1, 0], sizes = [1, 32], strides = [1, 1]} : vector<10x128xf32> to vector<1x32xf32>
    %8 = vector.extract_strided_slice %2 {offsets = [2, 0], sizes = [1, 32], strides = [1, 1]} : vector<10x128xf32> to vector<1x32xf32>
    %9 = vector.extract_strided_slice %2 {offsets = [3, 0], sizes = [1, 32], strides = [1, 1]} : vector<10x128xf32> to vector<1x32xf32>
    %10 = vector.extract_strided_slice %2 {offsets = [4, 0], sizes = [1, 32], strides = [1, 1]} : vector<10x128xf32> to vector<1x32xf32>
    %11 = vector.extract_strided_slice %2 {offsets = [5, 0], sizes = [1, 32], strides = [1, 1]} : vector<10x128xf32> to vector<1x32xf32>
    %12 = vector.extract_strided_slice %2 {offsets = [6, 0], sizes = [1, 32], strides = [1, 1]} : vector<10x128xf32> to vector<1x32xf32>
    %13 = vector.extract_strided_slice %2 {offsets = [7, 0], sizes = [1, 32], strides = [1, 1]} : vector<10x128xf32> to vector<1x32xf32>
    %14 = vector.extract_strided_slice %2 {offsets = [8, 0], sizes = [1, 32], strides = [1, 1]} : vector<10x128xf32> to vector<1x32xf32>
    %15 = vector.extract_strided_slice %2 {offsets = [9, 0], sizes = [1, 32], strides = [1, 1]} : vector<10x128xf32> to vector<1x32xf32>
    %c0_5 = arith.constant 0 : index
    %c0_6 = arith.constant 0 : index
    %c0_7 = arith.constant 0 : index
    %16 = vector.load %arg1[%c0_5, %c0_6, %c0_7] : memref<1x8x32xf32, #tpu.memory_space<vmem>>, vector<1x8x32xf32>
    %17 = vector.shape_cast %16 : vector<1x8x32xf32> to vector<8x32xf32>
    %c0_8 = arith.constant 0 : index
    %c0_9 = arith.constant 0 : index
    %c0_10 = arith.constant 0 : index
    %18 = vector.load %arg2[%c0_8, %c0_9, %c0_10] : memref<1x8x32xf32, #tpu.memory_space<vmem>>, vector<1x8x32xf32>
    %19 = vector.shape_cast %18 : vector<1x8x32xf32> to vector<8x32xf32>
    %c0_11 = arith.constant 0 : index
    %c0_12 = arith.constant 0 : index
    %c0_13 = arith.constant 0 : index
    %20 = vector.load %arg3[%c0_11, %c0_12, %c0_13] : memref<1x8x32xf32, #tpu.memory_space<vmem>>, vector<1x8x32xf32>
    %21 = vector.shape_cast %20 : vector<1x8x32xf32> to vector<8x32xf32>
    %c0_14 = arith.constant 0 : index
    %c0_15 = arith.constant 0 : index
    %c0_16 = arith.constant 0 : index
    %22 = vector.load %arg4[%c0_14, %c0_15, %c0_16] : memref<1x8x8xf32, #tpu.memory_space<vmem>>, vector<1x8x8xf32>
    %c0_17 = arith.constant 0 : index
    %c0_18 = arith.constant 0 : index
    %c0_19 = arith.constant 0 : index
    %23 = vector.load %arg5[%c0_17, %c0_18, %c0_19] : memref<1x1x8xf32, #tpu.memory_space<vmem>>, vector<1x1x8xf32>
    %cst = arith.constant dense<0.000000e+00> : vector<8x128xf32>
    %24 = tpu.matmul %17, %3, %cst {dimension_numbers = #tpu.dot_dimension_numbers<[1], [0], [0], [1], [0, 0, 1, 1], [], []>} : vector<8x32xf32>, vector<32x128xf32>, vector<8x128xf32> -> vector<8x128xf32>
    %25 = vector.extract_strided_slice %24 {offsets = [0, 0], sizes = [8, 32], strides = [1, 1]} : vector<8x128xf32> to vector<8x32xf32>
    %26 = vector.extract_strided_slice %24 {offsets = [0, 32], sizes = [8, 32], strides = [1, 1]} : vector<8x128xf32> to vector<8x32xf32>
    %27 = vector.extract_strided_slice %24 {offsets = [0, 64], sizes = [8, 32], strides = [1, 1]} : vector<8x128xf32> to vector<8x32xf32>
    %28 = vector.extract_strided_slice %25 {offsets = [0, 0], sizes = [8, 8], strides = [1, 1]} : vector<8x32xf32> to vector<8x8xf32>
    %29 = vector.shape_cast %28 : vector<8x8xf32> to vector<1x8x8xf32>
    %30 = vector.extract_strided_slice %26 {offsets = [0, 0], sizes = [8, 8], strides = [1, 1]} : vector<8x32xf32> to vector<8x8xf32>
    %31 = vector.shape_cast %30 : vector<8x8xf32> to vector<1x8x8xf32>
    %32 = vector.extract_strided_slice %27 {offsets = [0, 0], sizes = [8, 8], strides = [1, 1]} : vector<8x32xf32> to vector<8x8xf32>
    %33 = vector.shape_cast %32 : vector<8x8xf32> to vector<1x8x8xf32>
    "tpu.trace_start"() <{level = 10 : i32, message = "bqd,bkd->bqk"}> : () -> ()
    %cst_20 = arith.constant dense<0.000000e+00> : vector<1x8x8xf32>
    %34 = tpu.matmul %29, %31, %cst_20 {dimension_numbers = #tpu.dot_dimension_numbers<[2], [2], [1], [1], [0, 0, 0, 1, 1, 1], [0], [0]>} : vector<1x8x8xf32>, vector<1x8x8xf32>, vector<1x8x8xf32> -> vector<1x8x8xf32>
    "tpu.trace_stop"() : () -> ()
    %35 = arith.addf %34, %22 : vector<1x8x8xf32>
    %cst_21 = arith.constant -1.000000e+06 : f32
    %cst_22 = arith.constant 1.000000e+06 : f32
    %36 = vector.broadcast %cst_21 : f32 to vector<1x8x8xf32>
    %37 = arith.maximumf %36, %35 : vector<1x8x8xf32>
    %38 = vector.broadcast %cst_22 : f32 to vector<1x8x8xf32>
    %39 = arith.minimumf %38, %37 : vector<1x8x8xf32>
    %cst_23 = arith.constant 0.176776692 : f32
    %40 = vector.broadcast %cst_23 : f32 to vector<1x8x8xf32>
    %41 = arith.mulf %39, %40 : vector<1x8x8xf32>
    %cst_24 = arith.constant dense<0xFF800000> : vector<1x8xf32>
    %42 = vector.multi_reduction <maximumf>, %41, %cst_24 [2] : vector<1x8x8xf32> to vector<1x8xf32>
    %43 = vector.shape_cast %42 : vector<1x8xf32> to vector<1x8x1xf32>
    %44 = vector.broadcast %43 : vector<1x8x1xf32> to vector<1x8x8xf32>
    %45 = arith.subf %41, %44 : vector<1x8x8xf32>
    %46 = math.exp %45 : vector<1x8x8xf32>
    %cst_25 = arith.constant dense<0.000000e+00> : vector<1x8xf32>
    %47 = vector.multi_reduction <add>, %46, %cst_25 [2] : vector<1x8x8xf32> to vector<1x8xf32>
    %48 = vector.shape_cast %47 : vector<1x8xf32> to vector<1x8x1xf32>
    %49 = vector.broadcast %48 : vector<1x8x1xf32> to vector<1x8x8xf32>
    %50 = arith.divf %46, %49 : vector<1x8x8xf32>
    "tpu.trace_start"() <{level = 10 : i32, message = "bqk,bkd->bqd"}> : () -> ()
    %cst_26 = arith.constant dense<0.000000e+00> : vector<1x8x8xf32>
    %51 = tpu.matmul %50, %33, %cst_26 {dimension_numbers = #tpu.dot_dimension_numbers<[2], [1], [1], [2], [0, 0, 0, 1, 1, 2], [0], [0]>} : vector<1x8x8xf32>, vector<1x8x8xf32>, vector<1x8x8xf32> -> vector<1x8x8xf32>
    "tpu.trace_stop"() : () -> ()
    %52 = vector.shape_cast %51 : vector<1x8x8xf32> to vector<8x8xf32>
    %53 = vector.extract_strided_slice %25 {offsets = [0, 8], sizes = [8, 8], strides = [1, 1]} : vector<8x32xf32> to vector<8x8xf32>
    %54 = vector.shape_cast %53 : vector<8x8xf32> to vector<1x8x8xf32>
    %55 = vector.extract_strided_slice %26 {offsets = [0, 8], sizes = [8, 8], strides = [1, 1]} : vector<8x32xf32> to vector<8x8xf32>
    %56 = vector.shape_cast %55 : vector<8x8xf32> to vector<1x8x8xf32>
    %57 = vector.extract_strided_slice %27 {offsets = [0, 8], sizes = [8, 8], strides = [1, 1]} : vector<8x32xf32> to vector<8x8xf32>
    %58 = vector.shape_cast %57 : vector<8x8xf32> to vector<1x8x8xf32>
    "tpu.trace_start"() <{level = 10 : i32, message = "bqd,bkd->bqk"}> : () -> ()
    %cst_27 = arith.constant dense<0.000000e+00> : vector<1x8x8xf32>
    %59 = tpu.matmul %54, %56, %cst_27 {dimension_numbers = #tpu.dot_dimension_numbers<[2], [2], [1], [1], [0, 0, 0, 1, 1, 1], [0], [0]>} : vector<1x8x8xf32>, vector<1x8x8xf32>, vector<1x8x8xf32> -> vector<1x8x8xf32>
    "tpu.trace_stop"() : () -> ()
    %60 = arith.addf %59, %22 : vector<1x8x8xf32>
    %cst_28 = arith.constant -1.000000e+06 : f32
    %cst_29 = arith.constant 1.000000e+06 : f32
    %61 = vector.broadcast %cst_28 : f32 to vector<1x8x8xf32>
    %62 = arith.maximumf %61, %60 : vector<1x8x8xf32>
    %63 = vector.broadcast %cst_29 : f32 to vector<1x8x8xf32>
    %64 = arith.minimumf %63, %62 : vector<1x8x8xf32>
    %cst_30 = arith.constant 0.176776692 : f32
    %65 = vector.broadcast %cst_30 : f32 to vector<1x8x8xf32>
    %66 = arith.mulf %64, %65 : vector<1x8x8xf32>
    %cst_31 = arith.constant dense<0xFF800000> : vector<1x8xf32>
    %67 = vector.multi_reduction <maximumf>, %66, %cst_31 [2] : vector<1x8x8xf32> to vector<1x8xf32>
    %68 = vector.shape_cast %67 : vector<1x8xf32> to vector<1x8x1xf32>
    %69 = vector.broadcast %68 : vector<1x8x1xf32> to vector<1x8x8xf32>
    %70 = arith.subf %66, %69 : vector<1x8x8xf32>
    %71 = math.exp %70 : vector<1x8x8xf32>
    %cst_32 = arith.constant dense<0.000000e+00> : vector<1x8xf32>
    %72 = vector.multi_reduction <add>, %71, %cst_32 [2] : vector<1x8x8xf32> to vector<1x8xf32>
    %73 = vector.shape_cast %72 : vector<1x8xf32> to vector<1x8x1xf32>
    %74 = vector.broadcast %73 : vector<1x8x1xf32> to vector<1x8x8xf32>
    %75 = arith.divf %71, %74 : vector<1x8x8xf32>
    "tpu.trace_start"() <{level = 10 : i32, message = "bqk,bkd->bqd"}> : () -> ()
    %cst_33 = arith.constant dense<0.000000e+00> : vector<1x8x8xf32>
    %76 = tpu.matmul %75, %58, %cst_33 {dimension_numbers = #tpu.dot_dimension_numbers<[2], [1], [1], [2], [0, 0, 0, 1, 1, 2], [0], [0]>} : vector<1x8x8xf32>, vector<1x8x8xf32>, vector<1x8x8xf32> -> vector<1x8x8xf32>
    "tpu.trace_stop"() : () -> ()
    %77 = vector.shape_cast %76 : vector<1x8x8xf32> to vector<8x8xf32>
    %78 = vector.extract_strided_slice %25 {offsets = [0, 16], sizes = [8, 8], strides = [1, 1]} : vector<8x32xf32> to vector<8x8xf32>
    %79 = vector.shape_cast %78 : vector<8x8xf32> to vector<1x8x8xf32>
    %80 = vector.extract_strided_slice %26 {offsets = [0, 16], sizes = [8, 8], strides = [1, 1]} : vector<8x32xf32> to vector<8x8xf32>
    %81 = vector.shape_cast %80 : vector<8x8xf32> to vector<1x8x8xf32>
    %82 = vector.extract_strided_slice %27 {offsets = [0, 16], sizes = [8, 8], strides = [1, 1]} : vector<8x32xf32> to vector<8x8xf32>
    %83 = vector.shape_cast %82 : vector<8x8xf32> to vector<1x8x8xf32>
    "tpu.trace_start"() <{level = 10 : i32, message = "bqd,bkd->bqk"}> : () -> ()
    %cst_34 = arith.constant dense<0.000000e+00> : vector<1x8x8xf32>
    %84 = tpu.matmul %79, %81, %cst_34 {dimension_numbers = #tpu.dot_dimension_numbers<[2], [2], [1], [1], [0, 0, 0, 1, 1, 1], [0], [0]>} : vector<1x8x8xf32>, vector<1x8x8xf32>, vector<1x8x8xf32> -> vector<1x8x8xf32>
    "tpu.trace_stop"() : () -> ()
    %85 = arith.addf %84, %22 : vector<1x8x8xf32>
    %cst_35 = arith.constant -1.000000e+06 : f32
    %cst_36 = arith.constant 1.000000e+06 : f32
    %86 = vector.broadcast %cst_35 : f32 to vector<1x8x8xf32>
    %87 = arith.maximumf %86, %85 : vector<1x8x8xf32>
    %88 = vector.broadcast %cst_36 : f32 to vector<1x8x8xf32>
    %89 = arith.minimumf %88, %87 : vector<1x8x8xf32>
    %cst_37 = arith.constant 0.176776692 : f32
    %90 = vector.broadcast %cst_37 : f32 to vector<1x8x8xf32>
    %91 = arith.mulf %89, %90 : vector<1x8x8xf32>
    %cst_38 = arith.constant dense<0xFF800000> : vector<1x8xf32>
    %92 = vector.multi_reduction <maximumf>, %91, %cst_38 [2] : vector<1x8x8xf32> to vector<1x8xf32>
    %93 = vector.shape_cast %92 : vector<1x8xf32> to vector<1x8x1xf32>
    %94 = vector.broadcast %93 : vector<1x8x1xf32> to vector<1x8x8xf32>
    %95 = arith.subf %91, %94 : vector<1x8x8xf32>
    %96 = math.exp %95 : vector<1x8x8xf32>
    %cst_39 = arith.constant dense<0.000000e+00> : vector<1x8xf32>
    %97 = vector.multi_reduction <add>, %96, %cst_39 [2] : vector<1x8x8xf32> to vector<1x8xf32>
    %98 = vector.shape_cast %97 : vector<1x8xf32> to vector<1x8x1xf32>
    %99 = vector.broadcast %98 : vector<1x8x1xf32> to vector<1x8x8xf32>
    %100 = arith.divf %96, %99 : vector<1x8x8xf32>
    "tpu.trace_start"() <{level = 10 : i32, message = "bqk,bkd->bqd"}> : () -> ()
    %cst_40 = arith.constant dense<0.000000e+00> : vector<1x8x8xf32>
    %101 = tpu.matmul %100, %83, %cst_40 {dimension_numbers = #tpu.dot_dimension_numbers<[2], [1], [1], [2], [0, 0, 0, 1, 1, 2], [0], [0]>} : vector<1x8x8xf32>, vector<1x8x8xf32>, vector<1x8x8xf32> -> vector<1x8x8xf32>
    "tpu.trace_stop"() : () -> ()
    %102 = vector.shape_cast %101 : vector<1x8x8xf32> to vector<8x8xf32>
    %103 = vector.extract_strided_slice %25 {offsets = [0, 24], sizes = [8, 8], strides = [1, 1]} : vector<8x32xf32> to vector<8x8xf32>
    %104 = vector.shape_cast %103 : vector<8x8xf32> to vector<1x8x8xf32>
    %105 = vector.extract_strided_slice %26 {offsets = [0, 24], sizes = [8, 8], strides = [1, 1]} : vector<8x32xf32> to vector<8x8xf32>
    %106 = vector.shape_cast %105 : vector<8x8xf32> to vector<1x8x8xf32>
    %107 = vector.extract_strided_slice %27 {offsets = [0, 24], sizes = [8, 8], strides = [1, 1]} : vector<8x32xf32> to vector<8x8xf32>
    %108 = vector.shape_cast %107 : vector<8x8xf32> to vector<1x8x8xf32>
    "tpu.trace_start"() <{level = 10 : i32, message = "bqd,bkd->bqk"}> : () -> ()
    %cst_41 = arith.constant dense<0.000000e+00> : vector<1x8x8xf32>
    %109 = tpu.matmul %104, %106, %cst_41 {dimension_numbers = #tpu.dot_dimension_numbers<[2], [2], [1], [1], [0, 0, 0, 1, 1, 1], [0], [0]>} : vector<1x8x8xf32>, vector<1x8x8xf32>, vector<1x8x8xf32> -> vector<1x8x8xf32>
    "tpu.trace_stop"() : () -> ()
    %110 = arith.addf %109, %22 : vector<1x8x8xf32>
    %cst_42 = arith.constant -1.000000e+06 : f32
    %cst_43 = arith.constant 1.000000e+06 : f32
    %111 = vector.broadcast %cst_42 : f32 to vector<1x8x8xf32>
    %112 = arith.maximumf %111, %110 : vector<1x8x8xf32>
    %113 = vector.broadcast %cst_43 : f32 to vector<1x8x8xf32>
    %114 = arith.minimumf %113, %112 : vector<1x8x8xf32>
    %cst_44 = arith.constant 0.176776692 : f32
    %115 = vector.broadcast %cst_44 : f32 to vector<1x8x8xf32>
    %116 = arith.mulf %114, %115 : vector<1x8x8xf32>
    %cst_45 = arith.constant dense<0xFF800000> : vector<1x8xf32>
    %117 = vector.multi_reduction <maximumf>, %116, %cst_45 [2] : vector<1x8x8xf32> to vector<1x8xf32>
    %118 = vector.shape_cast %117 : vector<1x8xf32> to vector<1x8x1xf32>
    %119 = vector.broadcast %118 : vector<1x8x1xf32> to vector<1x8x8xf32>
    %120 = arith.subf %116, %119 : vector<1x8x8xf32>
    %121 = math.exp %120 : vector<1x8x8xf32>
    %cst_46 = arith.constant dense<0.000000e+00> : vector<1x8xf32>
    %122 = vector.multi_reduction <add>, %121, %cst_46 [2] : vector<1x8x8xf32> to vector<1x8xf32>
    %123 = vector.shape_cast %122 : vector<1x8xf32> to vector<1x8x1xf32>
    %124 = vector.broadcast %123 : vector<1x8x1xf32> to vector<1x8x8xf32>
    %125 = arith.divf %121, %124 : vector<1x8x8xf32>
    "tpu.trace_start"() <{level = 10 : i32, message = "bqk,bkd->bqd"}> : () -> ()
    %cst_47 = arith.constant dense<0.000000e+00> : vector<1x8x8xf32>
    %126 = tpu.matmul %125, %108, %cst_47 {dimension_numbers = #tpu.dot_dimension_numbers<[2], [1], [1], [2], [0, 0, 0, 1, 1, 2], [0], [0]>} : vector<1x8x8xf32>, vector<1x8x8xf32>, vector<1x8x8xf32> -> vector<1x8x8xf32>
    "tpu.trace_stop"() : () -> ()
    %127 = vector.shape_cast %126 : vector<1x8x8xf32> to vector<8x8xf32>
    %128 = tpu.concatenate %52, %77, %102, %127 in 1 : vector<8x8xf32>, vector<8x8xf32>, vector<8x8xf32>, vector<8x8xf32> -> vector<8x32xf32>
    %129 = vector.extract_strided_slice %3 {offsets = [0, 96], sizes = [32, 32], strides = [1, 1]} : vector<32x128xf32> to vector<32x32xf32>
    %cst_48 = arith.constant dense<0.000000e+00> : vector<8x32xf32>
    %130 = tpu.matmul %128, %129, %cst_48 {dimension_numbers = #tpu.dot_dimension_numbers<[1], [0], [0], [1], [0, 0, 1, 1], [], []>} : vector<8x32xf32>, vector<32x32xf32>, vector<8x32xf32> -> vector<8x32xf32>
    %131 = vector.broadcast %7 : vector<1x32xf32> to vector<8x32xf32>
    %132 = arith.addf %130, %131 : vector<8x32xf32>
    %133 = arith.addf %132, %17 : vector<8x32xf32>
    %cst_49 = arith.constant dense<0.000000e+00> : vector<8xf32>
    %134 = vector.multi_reduction <add>, %133, %cst_49 [1] : vector<8x32xf32> to vector<8xf32>
    %135 = vector.shape_cast %134 : vector<8xf32> to vector<8x1xf32>
    %cst_50 = arith.constant 3.200000e+01 : f32
    %136 = vector.broadcast %cst_50 : f32 to vector<8x1xf32>
    %137 = arith.divf %135, %136 : vector<8x1xf32>
    %138 = vector.broadcast %137 : vector<8x1xf32> to vector<8x32xf32>
    %139 = arith.subf %133, %138 : vector<8x32xf32>
    %140 = arith.mulf %139, %139 : vector<8x32xf32>
    %cst_51 = arith.constant dense<0.000000e+00> : vector<8xf32>
    %141 = vector.multi_reduction <add>, %140, %cst_51 [1] : vector<8x32xf32> to vector<8xf32>
    %142 = vector.shape_cast %141 : vector<8xf32> to vector<8x1xf32>
    %cst_52 = arith.constant 3.200000e+01 : f32
    %143 = vector.broadcast %cst_52 : f32 to vector<8x1xf32>
    %144 = arith.divf %142, %143 : vector<8x1xf32>
    %145 = vector.broadcast %137 : vector<8x1xf32> to vector<8x32xf32>
    %146 = arith.subf %133, %145 : vector<8x32xf32>
    %cst_53 = arith.constant 9.99999974E-6 : f32
    %147 = vector.broadcast %cst_53 : f32 to vector<8x1xf32>
    %148 = arith.addf %144, %147 : vector<8x1xf32>
    %149 = math.rsqrt %148 : vector<8x1xf32>
    %150 = vector.broadcast %149 : vector<8x1xf32> to vector<8x32xf32>
    %151 = arith.mulf %146, %150 : vector<8x32xf32>
    %152 = vector.broadcast %8 : vector<1x32xf32> to vector<8x32xf32>
    %153 = arith.mulf %151, %152 : vector<8x32xf32>
    %154 = vector.broadcast %9 : vector<1x32xf32> to vector<8x32xf32>
    %155 = arith.addf %153, %154 : vector<8x32xf32>
    %156 = vector.extract_strided_slice %4 {offsets = [0, 0], sizes = [32, 32], strides = [1, 1]} : vector<32x128xf32> to vector<32x32xf32>
    %cst_54 = arith.constant dense<0.000000e+00> : vector<8x32xf32>
    %157 = tpu.matmul %19, %156, %cst_54 {dimension_numbers = #tpu.dot_dimension_numbers<[1], [0], [0], [1], [0, 0, 1, 1], [], []>} : vector<8x32xf32>, vector<32x32xf32>, vector<8x32xf32> -> vector<8x32xf32>
    %158 = vector.extract_strided_slice %4 {offsets = [0, 32], sizes = [32, 32], strides = [1, 1]} : vector<32x128xf32> to vector<32x32xf32>
    %cst_55 = arith.constant dense<0.000000e+00> : vector<8x32xf32>
    %159 = tpu.matmul %21, %158, %cst_55 {dimension_numbers = #tpu.dot_dimension_numbers<[1], [0], [0], [1], [0, 0, 1, 1], [], []>} : vector<8x32xf32>, vector<32x32xf32>, vector<8x32xf32> -> vector<8x32xf32>
    %160 = vector.extract_strided_slice %4 {offsets = [0, 64], sizes = [32, 32], strides = [1, 1]} : vector<32x128xf32> to vector<32x32xf32>
    %cst_56 = arith.constant dense<0.000000e+00> : vector<8x32xf32>
    %161 = tpu.matmul %155, %160, %cst_56 {dimension_numbers = #tpu.dot_dimension_numbers<[1], [0], [0], [1], [0, 0, 1, 1], [], []>} : vector<8x32xf32>, vector<32x32xf32>, vector<8x32xf32> -> vector<8x32xf32>
    %162 = vector.extract_strided_slice %157 {offsets = [0, 0], sizes = [8, 8], strides = [1, 1]} : vector<8x32xf32> to vector<8x8xf32>
    %163 = vector.shape_cast %162 : vector<8x8xf32> to vector<1x8x8xf32>
    %164 = vector.extract_strided_slice %159 {offsets = [0, 0], sizes = [8, 8], strides = [1, 1]} : vector<8x32xf32> to vector<8x8xf32>
    %165 = vector.shape_cast %164 : vector<8x8xf32> to vector<1x8x8xf32>
    %166 = vector.extract_strided_slice %161 {offsets = [0, 0], sizes = [8, 8], strides = [1, 1]} : vector<8x32xf32> to vector<8x8xf32>
    %167 = vector.shape_cast %166 : vector<8x8xf32> to vector<1x8x8xf32>
    "tpu.trace_start"() <{level = 10 : i32, message = "bqd,bkd->bqk"}> : () -> ()
    %cst_57 = arith.constant dense<0.000000e+00> : vector<1x8x8xf32>
    %168 = tpu.matmul %163, %165, %cst_57 {dimension_numbers = #tpu.dot_dimension_numbers<[2], [2], [1], [1], [0, 0, 0, 1, 1, 1], [0], [0]>} : vector<1x8x8xf32>, vector<1x8x8xf32>, vector<1x8x8xf32> -> vector<1x8x8xf32>
    "tpu.trace_stop"() : () -> ()
    %169 = vector.broadcast %23 : vector<1x1x8xf32> to vector<1x8x8xf32>
    %170 = arith.addf %168, %169 : vector<1x8x8xf32>
    %cst_58 = arith.constant -1.000000e+06 : f32
    %cst_59 = arith.constant 1.000000e+06 : f32
    %171 = vector.broadcast %cst_58 : f32 to vector<1x8x8xf32>
    %172 = arith.maximumf %171, %170 : vector<1x8x8xf32>
    %173 = vector.broadcast %cst_59 : f32 to vector<1x8x8xf32>
    %174 = arith.minimumf %173, %172 : vector<1x8x8xf32>
    %cst_60 = arith.constant 0.176776692 : f32
    %175 = vector.broadcast %cst_60 : f32 to vector<1x8x8xf32>
    %176 = arith.mulf %174, %175 : vector<1x8x8xf32>
    %cst_61 = arith.constant dense<0xFF800000> : vector<1x8xf32>
    %177 = vector.multi_reduction <maximumf>, %176, %cst_61 [2] : vector<1x8x8xf32> to vector<1x8xf32>
    %178 = vector.shape_cast %177 : vector<1x8xf32> to vector<1x8x1xf32>
    %179 = vector.broadcast %178 : vector<1x8x1xf32> to vector<1x8x8xf32>
    %180 = arith.subf %176, %179 : vector<1x8x8xf32>
    %181 = math.exp %180 : vector<1x8x8xf32>
    %cst_62 = arith.constant dense<0.000000e+00> : vector<1x8xf32>
    %182 = vector.multi_reduction <add>, %181, %cst_62 [2] : vector<1x8x8xf32> to vector<1x8xf32>
    %183 = vector.shape_cast %182 : vector<1x8xf32> to vector<1x8x1xf32>
    %184 = vector.broadcast %183 : vector<1x8x1xf32> to vector<1x8x8xf32>
    %185 = arith.divf %181, %184 : vector<1x8x8xf32>
    "tpu.trace_start"() <{level = 10 : i32, message = "bqk,bkd->bqd"}> : () -> ()
    %cst_63 = arith.constant dense<0.000000e+00> : vector<1x8x8xf32>
    %186 = tpu.matmul %185, %167, %cst_63 {dimension_numbers = #tpu.dot_dimension_numbers<[2], [1], [1], [2], [0, 0, 0, 1, 1, 2], [0], [0]>} : vector<1x8x8xf32>, vector<1x8x8xf32>, vector<1x8x8xf32> -> vector<1x8x8xf32>
    "tpu.trace_stop"() : () -> ()
    %187 = vector.shape_cast %186 : vector<1x8x8xf32> to vector<8x8xf32>
    %188 = vector.extract_strided_slice %157 {offsets = [0, 8], sizes = [8, 8], strides = [1, 1]} : vector<8x32xf32> to vector<8x8xf32>
    %189 = vector.shape_cast %188 : vector<8x8xf32> to vector<1x8x8xf32>
    %190 = vector.extract_strided_slice %159 {offsets = [0, 8], sizes = [8, 8], strides = [1, 1]} : vector<8x32xf32> to vector<8x8xf32>
    %191 = vector.shape_cast %190 : vector<8x8xf32> to vector<1x8x8xf32>
    %192 = vector.extract_strided_slice %161 {offsets = [0, 8], sizes = [8, 8], strides = [1, 1]} : vector<8x32xf32> to vector<8x8xf32>
    %193 = vector.shape_cast %192 : vector<8x8xf32> to vector<1x8x8xf32>
    "tpu.trace_start"() <{level = 10 : i32, message = "bqd,bkd->bqk"}> : () -> ()
    %cst_64 = arith.constant dense<0.000000e+00> : vector<1x8x8xf32>
    %194 = tpu.matmul %189, %191, %cst_64 {dimension_numbers = #tpu.dot_dimension_numbers<[2], [2], [1], [1], [0, 0, 0, 1, 1, 1], [0], [0]>} : vector<1x8x8xf32>, vector<1x8x8xf32>, vector<1x8x8xf32> -> vector<1x8x8xf32>
    "tpu.trace_stop"() : () -> ()
    %195 = vector.broadcast %23 : vector<1x1x8xf32> to vector<1x8x8xf32>
    %196 = arith.addf %194, %195 : vector<1x8x8xf32>
    %cst_65 = arith.constant -1.000000e+06 : f32
    %cst_66 = arith.constant 1.000000e+06 : f32
    %197 = vector.broadcast %cst_65 : f32 to vector<1x8x8xf32>
    %198 = arith.maximumf %197, %196 : vector<1x8x8xf32>
    %199 = vector.broadcast %cst_66 : f32 to vector<1x8x8xf32>
    %200 = arith.minimumf %199, %198 : vector<1x8x8xf32>
    %cst_67 = arith.constant 0.176776692 : f32
    %201 = vector.broadcast %cst_67 : f32 to vector<1x8x8xf32>
    %202 = arith.mulf %200, %201 : vector<1x8x8xf32>
    %cst_68 = arith.constant dense<0xFF800000> : vector<1x8xf32>
    %203 = vector.multi_reduction <maximumf>, %202, %cst_68 [2] : vector<1x8x8xf32> to vector<1x8xf32>
    %204 = vector.shape_cast %203 : vector<1x8xf32> to vector<1x8x1xf32>
    %205 = vector.broadcast %204 : vector<1x8x1xf32> to vector<1x8x8xf32>
    %206 = arith.subf %202, %205 : vector<1x8x8xf32>
    %207 = math.exp %206 : vector<1x8x8xf32>
    %cst_69 = arith.constant dense<0.000000e+00> : vector<1x8xf32>
    %208 = vector.multi_reduction <add>, %207, %cst_69 [2] : vector<1x8x8xf32> to vector<1x8xf32>
    %209 = vector.shape_cast %208 : vector<1x8xf32> to vector<1x8x1xf32>
    %210 = vector.broadcast %209 : vector<1x8x1xf32> to vector<1x8x8xf32>
    %211 = arith.divf %207, %210 : vector<1x8x8xf32>
    "tpu.trace_start"() <{level = 10 : i32, message = "bqk,bkd->bqd"}> : () -> ()
    %cst_70 = arith.constant dense<0.000000e+00> : vector<1x8x8xf32>
    %212 = tpu.matmul %211, %193, %cst_70 {dimension_numbers = #tpu.dot_dimension_numbers<[2], [1], [1], [2], [0, 0, 0, 1, 1, 2], [0], [0]>} : vector<1x8x8xf32>, vector<1x8x8xf32>, vector<1x8x8xf32> -> vector<1x8x8xf32>
    "tpu.trace_stop"() : () -> ()
    %213 = vector.shape_cast %212 : vector<1x8x8xf32> to vector<8x8xf32>
    %214 = vector.extract_strided_slice %157 {offsets = [0, 16], sizes = [8, 8], strides = [1, 1]} : vector<8x32xf32> to vector<8x8xf32>
    %215 = vector.shape_cast %214 : vector<8x8xf32> to vector<1x8x8xf32>
    %216 = vector.extract_strided_slice %159 {offsets = [0, 16], sizes = [8, 8], strides = [1, 1]} : vector<8x32xf32> to vector<8x8xf32>
    %217 = vector.shape_cast %216 : vector<8x8xf32> to vector<1x8x8xf32>
    %218 = vector.extract_strided_slice %161 {offsets = [0, 16], sizes = [8, 8], strides = [1, 1]} : vector<8x32xf32> to vector<8x8xf32>
    %219 = vector.shape_cast %218 : vector<8x8xf32> to vector<1x8x8xf32>
    "tpu.trace_start"() <{level = 10 : i32, message = "bqd,bkd->bqk"}> : () -> ()
    %cst_71 = arith.constant dense<0.000000e+00> : vector<1x8x8xf32>
    %220 = tpu.matmul %215, %217, %cst_71 {dimension_numbers = #tpu.dot_dimension_numbers<[2], [2], [1], [1], [0, 0, 0, 1, 1, 1], [0], [0]>} : vector<1x8x8xf32>, vector<1x8x8xf32>, vector<1x8x8xf32> -> vector<1x8x8xf32>
    "tpu.trace_stop"() : () -> ()
    %221 = vector.broadcast %23 : vector<1x1x8xf32> to vector<1x8x8xf32>
    %222 = arith.addf %220, %221 : vector<1x8x8xf32>
    %cst_72 = arith.constant -1.000000e+06 : f32
    %cst_73 = arith.constant 1.000000e+06 : f32
    %223 = vector.broadcast %cst_72 : f32 to vector<1x8x8xf32>
    %224 = arith.maximumf %223, %222 : vector<1x8x8xf32>
    %225 = vector.broadcast %cst_73 : f32 to vector<1x8x8xf32>
    %226 = arith.minimumf %225, %224 : vector<1x8x8xf32>
    %cst_74 = arith.constant 0.176776692 : f32
    %227 = vector.broadcast %cst_74 : f32 to vector<1x8x8xf32>
    %228 = arith.mulf %226, %227 : vector<1x8x8xf32>
    %cst_75 = arith.constant dense<0xFF800000> : vector<1x8xf32>
    %229 = vector.multi_reduction <maximumf>, %228, %cst_75 [2] : vector<1x8x8xf32> to vector<1x8xf32>
    %230 = vector.shape_cast %229 : vector<1x8xf32> to vector<1x8x1xf32>
    %231 = vector.broadcast %230 : vector<1x8x1xf32> to vector<1x8x8xf32>
    %232 = arith.subf %228, %231 : vector<1x8x8xf32>
    %233 = math.exp %232 : vector<1x8x8xf32>
    %cst_76 = arith.constant dense<0.000000e+00> : vector<1x8xf32>
    %234 = vector.multi_reduction <add>, %233, %cst_76 [2] : vector<1x8x8xf32> to vector<1x8xf32>
    %235 = vector.shape_cast %234 : vector<1x8xf32> to vector<1x8x1xf32>
    %236 = vector.broadcast %235 : vector<1x8x1xf32> to vector<1x8x8xf32>
    %237 = arith.divf %233, %236 : vector<1x8x8xf32>
    "tpu.trace_start"() <{level = 10 : i32, message = "bqk,bkd->bqd"}> : () -> ()
    %cst_77 = arith.constant dense<0.000000e+00> : vector<1x8x8xf32>
    %238 = tpu.matmul %237, %219, %cst_77 {dimension_numbers = #tpu.dot_dimension_numbers<[2], [1], [1], [2], [0, 0, 0, 1, 1, 2], [0], [0]>} : vector<1x8x8xf32>, vector<1x8x8xf32>, vector<1x8x8xf32> -> vector<1x8x8xf32>
    "tpu.trace_stop"() : () -> ()
    %239 = vector.shape_cast %238 : vector<1x8x8xf32> to vector<8x8xf32>
    %240 = vector.extract_strided_slice %157 {offsets = [0, 24], sizes = [8, 8], strides = [1, 1]} : vector<8x32xf32> to vector<8x8xf32>
    %241 = vector.shape_cast %240 : vector<8x8xf32> to vector<1x8x8xf32>
    %242 = vector.extract_strided_slice %159 {offsets = [0, 24], sizes = [8, 8], strides = [1, 1]} : vector<8x32xf32> to vector<8x8xf32>
    %243 = vector.shape_cast %242 : vector<8x8xf32> to vector<1x8x8xf32>
    %244 = vector.extract_strided_slice %161 {offsets = [0, 24], sizes = [8, 8], strides = [1, 1]} : vector<8x32xf32> to vector<8x8xf32>
    %245 = vector.shape_cast %244 : vector<8x8xf32> to vector<1x8x8xf32>
    "tpu.trace_start"() <{level = 10 : i32, message = "bqd,bkd->bqk"}> : () -> ()
    %cst_78 = arith.constant dense<0.000000e+00> : vector<1x8x8xf32>
    %246 = tpu.matmul %241, %243, %cst_78 {dimension_numbers = #tpu.dot_dimension_numbers<[2], [2], [1], [1], [0, 0, 0, 1, 1, 1], [0], [0]>} : vector<1x8x8xf32>, vector<1x8x8xf32>, vector<1x8x8xf32> -> vector<1x8x8xf32>
    "tpu.trace_stop"() : () -> ()
    %247 = vector.broadcast %23 : vector<1x1x8xf32> to vector<1x8x8xf32>
    %248 = arith.addf %246, %247 : vector<1x8x8xf32>
    %cst_79 = arith.constant -1.000000e+06 : f32
    %cst_80 = arith.constant 1.000000e+06 : f32
    %249 = vector.broadcast %cst_79 : f32 to vector<1x8x8xf32>
    %250 = arith.maximumf %249, %248 : vector<1x8x8xf32>
    %251 = vector.broadcast %cst_80 : f32 to vector<1x8x8xf32>
    %252 = arith.minimumf %251, %250 : vector<1x8x8xf32>
    %cst_81 = arith.constant 0.176776692 : f32
    %253 = vector.broadcast %cst_81 : f32 to vector<1x8x8xf32>
    %254 = arith.mulf %252, %253 : vector<1x8x8xf32>
    %cst_82 = arith.constant dense<0xFF800000> : vector<1x8xf32>
    %255 = vector.multi_reduction <maximumf>, %254, %cst_82 [2] : vector<1x8x8xf32> to vector<1x8xf32>
    %256 = vector.shape_cast %255 : vector<1x8xf32> to vector<1x8x1xf32>
    %257 = vector.broadcast %256 : vector<1x8x1xf32> to vector<1x8x8xf32>
    %258 = arith.subf %254, %257 : vector<1x8x8xf32>
    %259 = math.exp %258 : vector<1x8x8xf32>
    %cst_83 = arith.constant dense<0.000000e+00> : vector<1x8xf32>
    %260 = vector.multi_reduction <add>, %259, %cst_83 [2] : vector<1x8x8xf32> to vector<1x8xf32>
    %261 = vector.shape_cast %260 : vector<1x8xf32> to vector<1x8x1xf32>
    %262 = vector.broadcast %261 : vector<1x8x1xf32> to vector<1x8x8xf32>
    %263 = arith.divf %259, %262 : vector<1x8x8xf32>
    "tpu.trace_start"() <{level = 10 : i32, message = "bqk,bkd->bqd"}> : () -> ()
    %cst_84 = arith.constant dense<0.000000e+00> : vector<1x8x8xf32>
    %264 = tpu.matmul %263, %245, %cst_84 {dimension_numbers = #tpu.dot_dimension_numbers<[2], [1], [1], [2], [0, 0, 0, 1, 1, 2], [0], [0]>} : vector<1x8x8xf32>, vector<1x8x8xf32>, vector<1x8x8xf32> -> vector<1x8x8xf32>
    "tpu.trace_stop"() : () -> ()
    %265 = vector.shape_cast %264 : vector<1x8x8xf32> to vector<8x8xf32>
    %266 = tpu.concatenate %187, %213, %239, %265 in 1 : vector<8x8xf32>, vector<8x8xf32>, vector<8x8xf32>, vector<8x8xf32> -> vector<8x32xf32>
    %267 = vector.extract_strided_slice %4 {offsets = [0, 96], sizes = [32, 32], strides = [1, 1]} : vector<32x128xf32> to vector<32x32xf32>
    %cst_85 = arith.constant dense<0.000000e+00> : vector<8x32xf32>
    %268 = tpu.matmul %266, %267, %cst_85 {dimension_numbers = #tpu.dot_dimension_numbers<[1], [0], [0], [1], [0, 0, 1, 1], [], []>} : vector<8x32xf32>, vector<32x32xf32>, vector<8x32xf32> -> vector<8x32xf32>
    %269 = vector.broadcast %10 : vector<1x32xf32> to vector<8x32xf32>
    %270 = arith.addf %268, %269 : vector<8x32xf32>
    %271 = arith.addf %270, %155 : vector<8x32xf32>
    %cst_86 = arith.constant -1.000000e+06 : f32
    %cst_87 = arith.constant 1.000000e+06 : f32
    %272 = vector.broadcast %cst_86 : f32 to vector<8x32xf32>
    %273 = arith.maximumf %272, %271 : vector<8x32xf32>
    %274 = vector.broadcast %cst_87 : f32 to vector<8x32xf32>
    %275 = arith.minimumf %274, %273 : vector<8x32xf32>
    %cst_88 = arith.constant dense<0.000000e+00> : vector<8xf32>
    %276 = vector.multi_reduction <add>, %275, %cst_88 [1] : vector<8x32xf32> to vector<8xf32>
    %277 = vector.shape_cast %276 : vector<8xf32> to vector<8x1xf32>
    %cst_89 = arith.constant 3.200000e+01 : f32
    %278 = vector.broadcast %cst_89 : f32 to vector<8x1xf32>
    %279 = arith.divf %277, %278 : vector<8x1xf32>
    %280 = vector.broadcast %279 : vector<8x1xf32> to vector<8x32xf32>
    %281 = arith.subf %275, %280 : vector<8x32xf32>
    %282 = arith.mulf %281, %281 : vector<8x32xf32>
    %cst_90 = arith.constant dense<0.000000e+00> : vector<8xf32>
    %283 = vector.multi_reduction <add>, %282, %cst_90 [1] : vector<8x32xf32> to vector<8xf32>
    %284 = vector.shape_cast %283 : vector<8xf32> to vector<8x1xf32>
    %cst_91 = arith.constant 3.200000e+01 : f32
    %285 = vector.broadcast %cst_91 : f32 to vector<8x1xf32>
    %286 = arith.divf %284, %285 : vector<8x1xf32>
    %287 = vector.broadcast %279 : vector<8x1xf32> to vector<8x32xf32>
    %288 = arith.subf %275, %287 : vector<8x32xf32>
    %cst_92 = arith.constant 9.99999997E-7 : f32
    %289 = vector.broadcast %cst_92 : f32 to vector<8x1xf32>
    %290 = arith.addf %286, %289 : vector<8x1xf32>
    %291 = math.rsqrt %290 : vector<8x1xf32>
    %292 = vector.broadcast %291 : vector<8x1xf32> to vector<8x32xf32>
    %293 = arith.mulf %288, %292 : vector<8x32xf32>
    %294 = vector.broadcast %11 : vector<1x32xf32> to vector<8x32xf32>
    %295 = arith.mulf %293, %294 : vector<8x32xf32>
    %296 = vector.broadcast %12 : vector<1x32xf32> to vector<8x32xf32>
    %297 = arith.addf %295, %296 : vector<8x32xf32>
    %cst_93 = arith.constant dense<0.000000e+00> : vector<8x128xf32>
    %298 = tpu.matmul %297, %5, %cst_93 {dimension_numbers = #tpu.dot_dimension_numbers<[1], [0], [0], [1], [0, 0, 1, 1], [], []>} : vector<8x32xf32>, vector<32x128xf32>, vector<8x128xf32> -> vector<8x128xf32>
    %299 = vector.broadcast %6 : vector<1x128xf32> to vector<8x128xf32>
    %300 = arith.addf %298, %299 : vector<8x128xf32>
    %cst_94 = arith.constant 0.000000e+00 : f32
    %301 = vector.broadcast %cst_94 : f32 to vector<8x128xf32>
    %302 = arith.maximumf %300, %301 : vector<8x128xf32>
    %cst_95 = arith.constant dense<0.000000e+00> : vector<8x32xf32>
    %303 = tpu.matmul %302, %1, %cst_95 {dimension_numbers = #tpu.dot_dimension_numbers<[1], [0], [0], [1], [0, 0, 1, 1], [], []>} : vector<8x128xf32>, vector<128x32xf32>, vector<8x32xf32> -> vector<8x32xf32>
    %304 = vector.broadcast %15 : vector<1x32xf32> to vector<8x32xf32>
    %305 = arith.addf %303, %304 : vector<8x32xf32>
    %306 = arith.addf %305, %297 : vector<8x32xf32>
    %cst_96 = arith.constant dense<0.000000e+00> : vector<8xf32>
    %307 = vector.multi_reduction <add>, %306, %cst_96 [1] : vector<8x32xf32> to vector<8xf32>
    %308 = vector.shape_cast %307 : vector<8xf32> to vector<8x1xf32>
    %cst_97 = arith.constant 3.200000e+01 : f32
    %309 = vector.broadcast %cst_97 : f32 to vector<8x1xf32>
    %310 = arith.divf %308, %309 : vector<8x1xf32>
    %311 = vector.broadcast %310 : vector<8x1xf32> to vector<8x32xf32>
    %312 = arith.subf %306, %311 : vector<8x32xf32>
    %313 = arith.mulf %312, %312 : vector<8x32xf32>
    %cst_98 = arith.constant dense<0.000000e+00> : vector<8xf32>
    %314 = vector.multi_reduction <add>, %313, %cst_98 [1] : vector<8x32xf32> to vector<8xf32>
    %315 = vector.shape_cast %314 : vector<8xf32> to vector<8x1xf32>
    %cst_99 = arith.constant 3.200000e+01 : f32
    %316 = vector.broadcast %cst_99 : f32 to vector<8x1xf32>
    %317 = arith.divf %315, %316 : vector<8x1xf32>
    %318 = vector.broadcast %310 : vector<8x1xf32> to vector<8x32xf32>
    %319 = arith.subf %306, %318 : vector<8x32xf32>
    %cst_100 = arith.constant 9.99999997E-7 : f32
    %320 = vector.broadcast %cst_100 : f32 to vector<8x1xf32>
    %321 = arith.addf %317, %320 : vector<8x1xf32>
    %322 = math.rsqrt %321 : vector<8x1xf32>
    %323 = vector.broadcast %322 : vector<8x1xf32> to vector<8x32xf32>
    %324 = arith.mulf %319, %323 : vector<8x32xf32>
    %325 = vector.broadcast %13 : vector<1x32xf32> to vector<8x32xf32>
    %326 = arith.mulf %324, %325 : vector<8x32xf32>
    %327 = vector.broadcast %14 : vector<1x32xf32> to vector<8x32xf32>
    %328 = arith.addf %326, %327 : vector<8x32xf32>
    %329 = vector.shape_cast %328 : vector<8x32xf32> to vector<1x8x32xf32>
    %c0_101 = arith.constant 0 : index
    %c0_102 = arith.constant 0 : index
    %c0_103 = arith.constant 0 : index
    %330 = vector.load %arg9[%c0_101, %c0_102, %c0_103] : memref<1x8x32xf32, #tpu.memory_space<vmem>>, vector<1x8x32xf32>
    tpu.vector_store %arg9[%c0_101, %c0_102, %c0_103], %329 {strides = array<i32>} : memref<1x8x32xf32, #tpu.memory_space<vmem>>, vector<1x8x32xf32>,
    return
  }
  func.func @transform_0(%arg0: i32) -> (i32, i32, i32) {
    %c0_i32 = arith.constant 0 : i32
    %c0_i32_0 = arith.constant 0 : i32
    %c0_i32_1 = arith.constant 0 : i32
    return %arg0, %c0_i32, %c0_i32_0 : i32, i32, i32
  }
  func.func @transform_1(%arg0: i32) -> (i32, i32, i32) {
    %c0_i32 = arith.constant 0 : i32
    %c0_i32_0 = arith.constant 0 : i32
    %c0_i32_1 = arith.constant 0 : i32
    return %arg0, %c0_i32, %c0_i32_0 : i32, i32, i32
  }
  func.func @transform_2(%arg0: i32) -> (i32, i32, i32) {
    %c0_i32 = arith.constant 0 : i32
    %c0_i32_0 = arith.constant 0 : i32
    %c0_i32_1 = arith.constant 0 : i32
    return %arg0, %c0_i32, %c0_i32_0 : i32, i32, i32
  }
  func.func @transform_3(%arg0: i32) -> (i32, i32, i32) {
    %c0_i32 = arith.constant 0 : i32
    %c0_i32_0 = arith.constant 0 : i32
    %c0_i32_1 = arith.constant 0 : i32
    return %arg0, %c0_i32, %c0_i32_0 : i32, i32, i32
  }
  func.func @transform_4(%arg0: i32) -> (i32, i32, i32) {
    %c0_i32 = arith.constant 0 : i32
    %c0_i32_0 = arith.constant 0 : i32
    %c0_i32_1 = arith.constant 0 : i32
    return %arg0, %c0_i32, %c0_i32_0 : i32, i32, i32
  }
  func.func @transform_5(%arg0: i32) -> (i32, i32) {
    %c0_i32 = arith.constant 0 : i32
    %c0_i32_0 = arith.constant 0 : i32
    %c0_i32_1 = arith.constant 0 : i32
    return %c0_i32, %c0_i32_0 : i32, i32
  }
  func.func @transform_6(%arg0: i32) -> (i32, i32) {
    %c0_i32 = arith.constant 0 : i32
    %c0_i32_0 = arith.constant 0 : i32
    %c0_i32_1 = arith.constant 0 : i32
    return %c0_i32, %c0_i32_0 : i32, i32
  }
  func.func @transform_7(%arg0: i32) -> (i32, i32) {
    %c0_i32 = arith.constant 0 : i32
    %c0_i32_0 = arith.constant 0 : i32
    %c0_i32_1 = arith.constant 0 : i32
    return %c0_i32, %c0_i32_0 : i32, i32
  }
  func.func @transform_8(%arg0: i32) -> (i32, i32, i32) {
    %c0_i32 = arith.constant 0 : i32
    %c0_i32_0 = arith.constant 0 : i32
    %c0_i32_1 = arith.constant 0 : i32
    return %arg0, %c0_i32, %c0_i32_0 : i32, i32, i32
  }
}

</mosaic_0001>

<bundles_post_ra>
// kernel: tpu_custom_call.1
= control target key start
LH: loop header
LB: loop body
LE: loop exit
PB: predicated region body
PF: predicated region fallthrough
CT: control target
= control target key end

     0   :  { %13 = vsyncpa [#allocation3], 0  ;;  %s3753_s0 = inlined_call_operand.vmem [shape: f32[2,8,32], index: 0, kind: input, shape index: {}]   ;;  %s3754_s1 = inlined_call_operand.vmem [shape: f32[2,8,32], index: 1, kind: input, shape index: {}]   ;;  %s3755_s2 = inlined_call_operand.vmem [shape: f32[2,8,32], index: 2, kind: input, shape index: {}]   ;;  %s3756_s3 = inlined_call_operand.vmem [shape: f32[2,8,8], index: 3, kind: input, shape index: {}]   ;;  %s3757_s4 = inlined_call_operand.vmem [shape: f32[2,1,8], index: 4, kind: input, shape index: {}]   ;;  %s3758_s5 = inlined_call_operand.vmem [shape: f32[96,128], index: 5, kind: input, shape index: {}]   ;;  %s3759_s6 = inlined_call_operand.vmem [shape: f32[128,32], index: 6, kind: input, shape index: {}]   ;;  %s3760_s7 = inlined_call_operand.hbm [shape: f32[10,128], index: 7, kind: input, shape index: {}]   ;;  %s3761_s8 = inlined_call_operand.hbm [shape: f32[2,8,32], index: 8, kind: output, shape index: {}]  }
   0x1   :  { %14 = vsyncpa [#allocation4], 0 }
   0x2   :  { %16 = vsyncpa [#allocation4 + $0x1], 0  ;;  %s3252_s27 = smov 0   ;;  %s3254_s28 = smov 0  }
   0x3   :  { %s3256_s29 = smov 0   ;;  %s3258_s30 = smov 0  }
   0x4 LB: > { %s3273_s9 = sadd.s32 4294967295, %s3184_s30   ;;  %s2655_s10 = sadd.s32 4294967294, %s3184_s30   ;;  %s3184_s30 = sphi %s3258_s30, %s3776_s30   ;;  %s3180_s29 = sphi %s3256_s29, %s3775_s29   ;;  %s3176_s28 = sphi %s3254_s28, %s3774_s28   ;;  %s3172_s27 = sphi %s3252_s27, %s3773_s27  }
   0x5   : > { %s3277_s11 = sadd.s32 1, %s3184_s30   ;;  %s222_s12 = sadd.s32 1, %s3180_s29 }
   0x6   : > { %s219_s13 = ssub.s32 %s3184_s30, %s3277_s11  ;;  %p232_p0 = scmp.ne.s32.totalorder %s3180_s29, %s3176_s28 }
   0x7   : > { %p220_p1 = scmp.eq.s32.totalorder %s219_s13, 0  ;;  %p233_p2 = scmp.eq.s32.totalorder %s3273_s9, 1 }
   0x8   : > { %p238_p3 = scmp.ne.s32.totalorder %s3176_s28, %s3172_s27  ;;  %p239_p4 = scmp.eq.s32.totalorder %s2655_s10, 1 }
   0x9   : > { %s3288_s14 = scalar_select %p220_p1, %s3180_s29, %s222_s12  }
   0xa   : > { %p3290_p5 = por %p233_p2, %p232_p0  ;;  %p3294_p6 = por %p239_p4, %p238_p3 }
   0xb   : > { %p2656_p7 = scmp.ge.s32.totalorder %s3184_s30, 1  ;;  %p246_p8 = scmp.lt.s32.totalorder %s3184_s30, 3 }
   0xc   : > { %s3767_s16 = scalar_select %p3294_p6, 1, 0 }
   0xd   : > { %p3001_p9 = scmp.eq.s32.totalorder %s3273_s9, 0  ;;  %p3301_p10 = pnand %p2656_p7, %p246_p8 }
   0xe   : > { %s3186_s18 = smov [#allocation2]  }
   0xf   : > { %s264_s19 = sshll.u32 %s3186_s18, 4  ;;  %p2993_p11 = pneg %p3301_p10  ;;  %s265_s19 = int_to_ptr.vmem [resolvable:$true] %s264_s19 }
  0x10   : > { %s3105_s20 = scalar_lea.vmem %s265_s19, 256  ;;  %p3113_p3 = scmp.lt.s32.totalorder %s265_s19, %s265_s19 }
  0x11   : > { %p2994_p12 = pnand %p3001_p9, %p2993_p11  ;;  %p3106_p0 = scmp.ne.s32.totalorder %s265_s19, %s3105_s20 }
  0x12   : > { %p3114_p4 = scmp.lt.s32.totalorder %s3105_s20, %s3105_s20 }
  0x13   : > { %p3096_p13 = pneg %p2994_p12 }
  0x14   : > { %p3115_p6 = por %p3114_p4, %p3113_p3 }
  0x15   : > { %p3108_p1 = pnand %p3106_p0, %p3096_p13 }
  0x17   : > { %p3109_p2 = pneg %p3108_p1 }
  0x19   : > { %p3116_p7 = pnand %p3115_p6, %p3109_p2 }
  0x1b   : > { %3119 = shalt.err (!%p3116_p7)
}
  0x1c   : > { %s3187_s21 = smov 128   ;;  %s3188_s22 = smov 8  }
  0x1d   : > { %2996 = dma.hbm_to_vmem [thread:$0]  (!%p2994_p12), %s3760_s7, 256, %s265_s19, [#allocation3], %s3187_s21, %s3187_s21, %s3188_s22  }
  0x1e   : > { %314 = sbr.rel (%p3301_p10) target bundleno = 3627 (0xe2b), region = 52 }
  0x23   : > { %3163 = dma.done.wait (%p3001_p9), [#allocation3], 256  }
  0x24   : > { %3165 = vsyncadd (%p3001_p9), [#allocation3], 4294967040  ;;  %p362_p8 = scmp.lt.s32.totalorder %s3273_s9, 1  ;;  %v3189_v0 = vmov 0.0   ;;  %vm3190_vm0 = vmmov 0   ;;  %v3334_v1 = vld [vmem:[%s3758_s5 + $0x18] sm:$0xff] }
  0x25   : > { %2795 = vmatprep.subr.mxu1 %v3189_v0  ;;  %2803 = vmatprep.mubr.msk.f32.mxu1 %vm3190_vm0, %v3189_v0  ;;  %v3339_v2 = vld [vmem:[%s3758_s5 + $0x10] sm:$0xff]  ;;  %v3346_v3 = vld [vmem:[%s3758_s5 + $0x8] sm:$0xff]  ;;  %v3357_v4 = vld [vmem:[%s3758_s5] sm:$0xff]  ;;  %vm416_vm1 = vcmask 261120   ;;  %s3191_s10 = smov 120   ;;  %s3192_s12 = smov 96  }
  0x26   : > { %s3323_s25 = scalar_select %p362_p8, %s3273_s9, 1  ;;  %2816 = vmatprep.subr.mxu0 %v3189_v0  ;;  %2818 = vmatprep.mubr.msk.f32.mxu0 %vm3190_vm0, %v3189_v0  ;;  %vm493_vm2 = vcmask 64512   ;;  %vm1175_vm3 = vcmask 130048   ;;  %vm1177_vm4 = vcmask 195584  }
  0x27   : > { %2796 = vmatpush3.msra.mxu1 %v3334_v1  ;;  %s3193_s13 = smov 80   ;;  %s3194_s17 = smov 88  }
  0x28   : > { %s3329_s26 = sshll.u32 %s3323_s25, 3  ;;  %2797 = vmatprep.subr.mxu1 %v3189_v0  ;;  %s3195_s18 = smov 72  }
  0x29   : > { %s365_s22 = scalar_lea.vmem %s3753_s0, %s3329_s26  ;;  %2798 = vmatpush3.msra.mxu1 %v3339_v2  ;;  %s3196_s19 = smov 112  }
  0x2a   : > { %2799 = vmatprep.subr.mxu1 %v3189_v0  ;;  %v3360_v5 = vld [vmem:[%s365_s22] sm:$0xff]  ;;  %s3197_s20 = smov 104   ;;  %s377_s23 = scalar_lea.vmem %s3756_s3, %s3329_s26 }
  0x2b   : > { %2800 = vmatpush3.msra.mxu1 %v3346_v3  ;;  %v414_v15 = vld [vmem:[%s377_s23] sm:$0xff]  ;;  %s3198_s24 = smov 56   ;;  %s3202_s21 = smov 32  }
  0x2c   : > { %2801 = vmatprep.subr.mxu1 %v3189_v0  ;;  %s3765_s22 = smov 16   ;;  %s3764_s23 = smov 24  }
  0x2d   : > { %2802 = vmatpush3.msra.mxu1 %v3357_v4 }
  0x2e   : > { %2804 = vmatmul.mubr.msk.f32.vlgmr.msra.gmra.mxu1 %vm416_vm1, %v3360_v5  ;;  %2806 = vmatprep.subr.mxu1 %v3189_v0 }
  0x2f   : > { %2808 = vmatprep.mubr.msk.f32.mxu1 %vm3190_vm0, %v3189_v0 }
  0xee   : > { %v3369_v6 = vpop.f32.mrf.mxu1 }
  0xef   : > { %658 = vrot.lane.b32.xlu1 %v3369_v6, %s3191_s10  ;;  %491 = vrot.lane.b32.xlu0 %v3369_v6, %s3192_s12 }
  0xf0   : > { %v2805_v7 = vpop.f32.mrf.mxu1 }
  0xf3   : > { %828 = vrot.lane.b32.xlu1 %v3369_v6, %s3193_s13  ;;  %660 = vrot.lane.b32.xlu0 %v3369_v6, %s3194_s17  ;;  %s3762_s13 = smov 64   ;;  %s3200_s17 = smov 48  }
  0xf7   : > { %996 = vrot.lane.b32.xlu1 %v3369_v6, %s3195_s18  ;;  %826 = vrot.lane.b32.xlu0 %v3369_v6, %s3196_s19  ;;  %s3201_s18 = smov 40  }
  0xfb   : > { %994 = vrot.lane.b32.xlu0 %v3369_v6, %s3197_s20 }
 0x161   : > { %v659_v8 = vpop.permute.xlu1 %658  ;;  %v492_v9 = vpop.permute.xlu0 %491 }
 0x162   : > { %2807 = vmatpush3.xpose.msk.msra.mxu1 %vm493_vm2, %v492_v9 }
 0x163   : > { %2811 = vmatprep.subr.mxu1 %v3189_v0 }
 0x165   : > { %2809 = vmatmul.mubr.msk.f32.vlgmr.msra.gmra.mxu1 %vm493_vm2, %v3369_v6  ;;  %v661_v10 = vpop.permute.xlu0 %660  ;;  %v829_v11 = vpop.permute.xlu1 %828 }
 0x166   : > { %2817 = vmatpush3.xpose.msk.msra.mxu0 %vm493_vm2, %v661_v10  ;;  %2813 = vmatprep.mubr.msk.f32.mxu1 %vm3190_vm0, %v3189_v0 }
 0x167   : > { %2826 = vmatprep.subr.mxu0 %v3189_v0 }
 0x169   : > { %2819 = vmatmul.mubr.msk.f32.vlgmr.msra.gmra.mxu0 %vm493_vm2, %v659_v8  ;;  %v827_v12 = vpop.permute.xlu0 %826  ;;  %v997_v13 = vpop.permute.xlu1 %996 }
 0x16a   : > { %2827 = vmatpush3.xpose.msk.msra.mxu0 %vm493_vm2, %v829_v11  ;;  %2828 = vmatprep.mubr.msk.f32.mxu0 %vm3190_vm0, %v3189_v0 }
 0x16b   : > { %2836 = vmatprep.subr.mxu0 %v3189_v0 }
 0x16d   : > { %2829 = vmatmul.mubr.msk.f32.vlgmr.msra.gmra.mxu0 %vm493_vm2, %v827_v12  ;;  %v995_v14 = vpop.permute.xlu0 %994 }
 0x16e   : > { %2837 = vmatpush3.xpose.msk.msra.mxu0 %vm493_vm2, %v997_v13  ;;  %2838 = vmatprep.mubr.msk.f32.mxu0 %vm3190_vm0, %v3189_v0 }
 0x16f   : > { %2868 = vmatprep.subr.mxu0 %v3189_v0 }
 0x171   : > { %2839 = vmatmul.mubr.msk.f32.vlgmr.msra.gmra.mxu0 %vm493_vm2, %v995_v14 }
 0x172   : > { %2876 = vmatprep.mubr.msk.f32.mxu0 %vm3190_vm0, %v3189_v0 }
 0x225   : > { %v564_v16 = vpop.f32.mrf.mxu1 }
 0x226   : > { %v565_v17 = vadd.f32 %v564_v16, %v414_v15 }
 0x227   : > { %v2810_v18 = vpop.f32.mrf.mxu1 }
 0x228   : > { %v2669_v19 = vclamps-f32 %v565_v17, 1000000.0  ;;  %v3445_v18 = vld [vmem:[%s3758_s5 + $0x38] sm:$0xff] }
 0x229   : > { %v732_v20 = vpop.f32.mrf.mxu0 }
 0x22a   : > { %v570_v21 = vmul.f32 0.17677669, %v2669_v19  ;;  %v733_v22 = vadd.f32 %v732_v20, %v414_v15 }
 0x22b   : > { %v2820_v23 = vpop.f32.mrf.mxu0 }
 0x22c   : > { %v2673_v24 = vclamps-f32 %v733_v22, 1000000.0  ;;  %v571_v25 = vsel %vm493_vm2, %v570_v21, -inf }
 0x22d   : > { %v900_v26 = vpop.f32.mrf.mxu0  ;;  %572 = vmax.xlane.f32.xlu1 %v571_v25 }
 0x22e   : > { %v738_v27 = vmul.f32 0.17677669, %v2673_v24  ;;  %v901_v28 = vadd.f32 %v900_v26, %v414_v15 }
 0x22f   : > { %v2830_v29 = vpop.f32.mrf.mxu0 }
 0x230   : > { %v2677_v30 = vclamps-f32 %v901_v28, 1000000.0  ;;  %v739_v31 = vsel %vm493_vm2, %v738_v27, -inf }
 0x231   : > { %740 = vmax.xlane.f32.xlu0 %v739_v31  ;;  %v1068_v32 = vpop.f32.mrf.mxu0  ;;  %v3477_v31 = vld [vmem:[%s3758_s5 + $0x28] sm:$0xff] }
 0x232   : > { %v906_v33 = vmul.f32 0.17677669, %v2677_v30  ;;  %v1069_v34 = vadd.f32 %v1068_v32, %v414_v15 }
 0x233   : > { %v2840_v35 = vpop.f32.mrf.mxu0 }
 0x234   : > { %v2681_v36 = vclamps-f32 %v1069_v34, 1000000.0  ;;  %v907_v37 = vsel %vm493_vm2, %v906_v33, -inf }
 0x235   : > { %908 = vmax.xlane.f32.xlu0 %v907_v37 }
 0x236   : > { %v1074_v38 = vmul.f32 0.17677669, %v2681_v36 }
 0x238   : > { %v1075_v39 = vsel %vm493_vm2, %v1074_v38, -inf }
 0x239   : > { %1076 = vmax.xlane.f32.xlu1 %v1075_v39 }
 0x24a   : > { %750 = vrot.lane.b32.xlu1 %v3369_v6, %s3198_s24 }
 0x2b6   : > { %v573_v40 = vpop.xlane.xlu1 %572 }
 0x2b7   : > { %v574_v41 = vsub.f32 %v570_v21, %v573_v40 }
 0x2b9   : > { %v575_v42 = vmul.f32 1.442695, %v574_v41 }
 0x2ba   : > { %v741_v43 = vpop.xlane.xlu0 %740 }
 0x2bb   : > { %3056 = vpow2.f32 %v575_v42  ;;  %v742_v44 = vsub.f32 %v738_v27, %v741_v43 }
 0x2bd   : > { %v743_v45 = vmul.f32 1.442695, %v742_v44 }
 0x2be   : > { %v909_v55 = vpop.xlane.xlu0 %908 }
 0x2bf   : > { %3058 = vpow2.f32 %v743_v45  ;;  %v910_v56 = vsub.f32 %v906_v33, %v909_v55 }
 0x2c1   : > { %v911_v57 = vmul.f32 1.442695, %v910_v56 }
 0x2c2   : > { %v1077_v46 = vpop.xlane.xlu1 %1076 }
 0x2c3   : > { %v1078_v47 = vsub.f32 %v1074_v38, %v1077_v46 }
 0x2c5   : > { %v1079_v48 = vmul.f32 1.442695, %v1078_v47 }
 0x2c6   : > { %v751_v60 = vpop.permute.xlu1 %750 }
 0x2c7   : > { %3060 = vpow2.f32 %v1079_v48  ;;  %v1179_v48 = vlaneseq }
 0x2c8   : > { %v3057_v49 = vpop.eup %3056  ;;  %3062 = vpow2.f32 %v911_v57 }
 0x2c9   : > { %v577_v50 = vsel %vm493_vm2, %v3057_v49, 0.0 }
 0x2ca   : > { %578 = vadd.xlane.f32.xlu0 %v577_v50 }
 0x2cc   : > { %v3059_v51 = vpop.eup %3058 }
 0x2cd   : > { %v745_v52 = vsel %vm493_vm2, %v3059_v51, 0.0 }
 0x2ce   : > { %746 = vadd.xlane.f32.xlu1 %v745_v52 }
 0x2d4   : > { %v3061_v53 = vpop.eup %3060 }
 0x2d5   : > { %v1081_v54 = vsel %vm493_vm2, %v3061_v53, 0.0  ;;  %v3063_v58 = vpop.eup %3062 }
 0x2d6   : > { %1082 = vadd.xlane.f32.xlu1 %v1081_v54  ;;  %v913_v59 = vsel %vm493_vm2, %v3063_v58, 0.0 }
 0x2e0   : > { %582 = vrot.lane.b32.xlu0 %v3369_v6, %s3762_s13  ;;  %s3203_s13 = smov 8  }
 0x2e7   : > { %918 = vrot.lane.b32.xlu1 %v3369_v6, %s3200_s17  ;;  %s373_s17 = scalar_lea.vmem %s3755_s2, %s3329_s26 }
 0x2e8   : > { %v413_v40 = vld [vmem:[%s373_s17] sm:$0xff] }
 0x2eb   : > { %1193 = vrot.lane.b32.xlu1 %v3334_v1, %s3202_s21  ;;  %v3461_v1 = vld [vmem:[%s3758_s5 + $0x20] sm:$0xff] }
 0x2ef   : > { %1189 = vrot.lane.b32.xlu1 %v3346_v3, %s3202_s21 }
 0x2f3   : > { %1380 = vrot.lane.b32.xlu1 %v3445_v18, %s3192_s12 }
 0x2f7   : > { %1187 = vrot.lane.b32.xlu1 %v3357_v4, %s3202_s21 }
 0x2ff   : > { %914 = vadd.xlane.f32.xlu0 %v913_v59 }
 0x315   : > { %1086 = vrot.lane.b32.xlu0 %v3369_v6, %s3201_s18  ;;  %s380_s18 = scalar_lea.vmem %s3757_s4, %s3323_s25  ;;  %s3770_s25 = smov 16  }
 0x319   : > { %1191 = vrot.lane.b32.xlu0 %v3339_v2, %s3202_s21  ;;  %v3454_v2 = vld [vmem:[%s3758_s5 + $0x30] sm:$0xff] }
 0x31a   : > { %1378 = vrot.lane.b32.xlu1 %v3454_v2, %s3192_s12 }
 0x31e   : > { %1374 = vrot.lane.b32.xlu1 %v3461_v1, %s3192_s12 }
 0x353   : > { %v579_v61 = vpop.xlane.xlu0 %578 }
 0x354   : > { %3064 = vrcp.f32 %v579_v61 }
 0x357   : > { %v583_v62 = vpop.permute.xlu0 %582  ;;  %v747_v63 = vpop.xlane.xlu1 %746 }
 0x358   : > { %3066 = vrcp.f32 %v747_v63  ;;  %2812 = vmatpush3.msra.mxu1 %v583_v62 }
 0x359   : > { %2821 = vmatprep.subr.mxu1 %v3189_v0 }
 0x35f   : > { %v1083_v8 = vpop.xlane.xlu1 %1082 }
 0x361   : > { %v3065_v7 = vpop.eup %3064 }
 0x362   : > { %v581_v9 = vmul.f32 %v3065_v7, %v3057_v49  ;;  %v3524_v49 = vshrl.u32 %v1179_v48, 7 }
 0x363   : > { %v919_v11 = vpop.permute.xlu1 %918 }
 0x364   : > { %2814 = vmatmul.mubr.msk.f32.vlgmr.msra.gmra.mxu1 %vm493_vm2, %v581_v9  ;;  %v1181_v50 = vsub.s32 1, %v3524_v49 }
 0x365   : > { %v3067_v10 = vpop.eup %3066  ;;  %2822 = vmatpush3.msra.mxu1 %v751_v60  ;;  %2823 = vmatprep.mubr.msk.f32.mxu1 %vm3190_vm0, %v3189_v0 }
 0x366   : > { %2831 = vmatprep.subr.mxu1 %v3189_v0  ;;  %v749_v6 = vmul.f32 %v3067_v10, %v3059_v51  ;;  %v3527_v51 = vld [vmem:[#allocation2] sm:$0xff] }
 0x367   : > { %v1194_v3 = vpop.permute.xlu1 %1193  ;;  %v1182_v52 = vrot.slane %v3527_v51, %v1181_v50 }
 0x368   : > { %2824 = vmatmul.mubr.msk.f32.vlgmr.msra.gmra.mxu1 %vm493_vm2, %v749_v6  ;;  %v2687_v6 = vld [vmem:[%s380_s18] ss:$0 sm:$0xff] }
 0x369   : > { %2832 = vmatpush3.msra.mxu1 %v919_v11  ;;  %2833 = vmatprep.mubr.msk.f32.mxu1 %vm3190_vm0, %v3189_v0 }
 0x36a   : > { %2841 = vmatprep.subr.mxu1 %v3189_v0 }
 0x36b   : > { %v1190_v4 = vpop.permute.xlu1 %1189 }
 0x36f   : > { %v1381_v21 = vpop.permute.xlu1 %1380 }
 0x370   : > { %2869 = vmatpush3.msra.mxu0 %v1381_v21 }
 0x371   : > { %2870 = vmatprep.subr.mxu0 %v3189_v0 }
 0x373   : > { %v1188_v25 = vpop.permute.xlu1 %1187 }
 0x388   : > { %v915_v12 = vpop.xlane.xlu0 %914 }
 0x389   : > { %3068 = vrcp.f32 %v915_v12 }
 0x38a   : > { %3070 = vrcp.f32 %v1083_v8 }
 0x38c   : > { %v1087_v16 = vpop.permute.xlu0 %1086  ;;  %v1379_v26 = vpop.permute.xlu1 %1378 }
 0x38d   : > { %2871 = vmatpush3.msra.mxu0 %v1379_v26 }
 0x38e   : > { %2872 = vmatprep.subr.mxu0 %v3189_v0 }
 0x390   : > { %v1192_v19 = vpop.permute.xlu0 %1191  ;;  %v1375_v39 = vpop.permute.xlu1 %1374 }
 0x396   : > { %v3069_v13 = vpop.eup %3068 }
 0x397   : > { %v917_v14 = vmul.f32 %v3069_v13, %v3063_v58  ;;  %v3071_v15 = vpop.eup %3070 }
 0x398   : > { %v1085_v17 = vmul.f32 %v3071_v15, %v3061_v53 }
 0x399   : > { %2834 = vmatmul.mubr.msk.f32.vlgmr.msra.gmra.mxu1 %vm493_vm2, %v917_v14 }
 0x39a   : > { %2842 = vmatpush3.msra.mxu1 %v1087_v16  ;;  %2843 = vmatprep.mubr.msk.f32.mxu1 %vm3190_vm0, %v3189_v0 }
 0x39b   : > { %2846 = vmatprep.subr.mxu1 %v3189_v0 }
 0x39d   : > { %2844 = vmatmul.mubr.msk.f32.vlgmr.msra.gmra.mxu1 %vm493_vm2, %v1085_v17 }
 0x39e   : > { %2854 = vmatprep.mubr.msk.f32.mxu1 %vm3190_vm0, %v3189_v0  ;;  %2847 = vmatpush3.msra.mxu1 %v1194_v3 }
 0x39f   : > { %2848 = vmatprep.subr.mxu1 %v3189_v0 }
 0x3a0   : > { %2849 = vmatpush3.msra.mxu1 %v1192_v19 }
 0x3a1   : > { %2850 = vmatprep.subr.mxu1 %v3189_v0 }
 0x3a2   : > { %2851 = vmatpush3.msra.mxu1 %v1190_v4 }
 0x3a3   : > { %2852 = vmatprep.subr.mxu1 %v3189_v0 }
 0x3a4   : > { %2853 = vmatpush3.msra.mxu1 %v1188_v25 }
 0x3a5   : > { %2857 = vmatprep.subr.mxu1 %v3189_v0 }
 0x424   : > { %v654_v20 = vpop.f32.mrf.mxu1 }
 0x426   : > { %v2815_v22 = vpop.f32.mrf.mxu1 }
 0x428   : > { %v822_v23 = vpop.f32.mrf.mxu1 }
 0x429   : > { %1163 = vrot.lane.b32.xlu0 %v822_v23, %s3203_s13 }
 0x42a   : > { %v2825_v24 = vpop.f32.mrf.mxu1 }
 0x459   : > { %v990_v27 = vpop.f32.mrf.mxu1 }
 0x45a   : > { %1167 = vrot.lane.b32.xlu0 %v990_v27, %s3765_s22  ;;  %s369_s22 = scalar_lea.vmem %s3754_s1, %s3329_s26  ;;  %s3769_s26 = smov 64  }
 0x45b   : > { %v2835_v28 = vpop.f32.mrf.mxu1  ;;  %v412_v41 = vld [vmem:[%s369_s22] sm:$0xff] }
 0x45d   : > { %v1158_v29 = vpop.f32.mrf.mxu1 }
 0x45e   : > { %1171 = vrot.lane.b32.xlu0 %v1158_v29, %s3764_s23 }
 0x45f   : > { %v2845_v30 = vpop.f32.mrf.mxu1 }
 0x462   : > { %1376 = vrot.lane.b32.xlu0 %v3477_v31, %s3192_s12 }
 0x49b   : > { %v1164_v32 = vpop.permute.xlu0 %1163 }
 0x49c   : > { %v1174_v34 = vsel %vm493_vm2, %v654_v20, %v1164_v32 }
 0x4cc   : > { %v1168_v33 = vpop.permute.xlu0 %1167 }
 0x4cd   : > { %v1176_v35 = vsel %vm1175_vm3, %v1174_v34, %v1168_v33 }
 0x4d0   : > { %v1172_v36 = vpop.permute.xlu0 %1171 }
 0x4d1   : > { %v1178_v37 = vsel %vm1177_vm4, %v1176_v35, %v1172_v36 }
 0x4d2   : > { %2855 = vmatmul.mubr.msk.f32.vlgmr.msra.gmra.mxu1 %vm416_vm1, %v1178_v37 }
 0x4d3   : > { %2858 = vmatpush3.msra.mxu1 %v3445_v18  ;;  %2865 = vmatprep.mubr.msk.f32.mxu1 %vm3190_vm0, %v3189_v0 }
 0x4d4   : > { %v1377_v38 = vpop.permute.xlu0 %1376  ;;  %2859 = vmatprep.subr.mxu1 %v3189_v0 }
 0x4d5   : > { %2873 = vmatpush3.msra.mxu0 %v1377_v38  ;;  %2860 = vmatpush3.msra.mxu1 %v3454_v2 }
 0x4d6   : > { %2874 = vmatprep.subr.mxu0 %v3189_v0  ;;  %2861 = vmatprep.subr.mxu1 %v3189_v0 }
 0x4d7   : > { %2875 = vmatpush3.msra.mxu0 %v1375_v39  ;;  %2862 = vmatpush3.msra.mxu1 %v3477_v31 }
 0x4d8   : > { %2877 = vmatmul.mubr.msk.f32.vlgmr.msra.gmra.mxu0 %vm416_vm1, %v413_v40  ;;  %2863 = vmatprep.subr.mxu1 %v3189_v0  ;;  %v1289_v40 = vsub.s32 2, %v3524_v49 }
 0x4d9   : > { %2864 = vmatpush3.msra.mxu1 %v3461_v1  ;;  %2890 = vmatprep.subr.mxu0 %v3189_v0 }
 0x4da   : > { %2866 = vmatmul.mubr.msk.f32.vlgmr.msra.gmra.mxu1 %vm416_vm1, %v412_v41  ;;  %2892 = vmatprep.mubr.msk.f32.mxu0 %vm3190_vm0, %v3189_v0  ;;  %v1294_v41 = vsub.s32 3, %v3524_v49 }
 0x4db   : > { %2879 = vmatprep.subr.mxu1 %v3189_v0  ;;  %2887 = vmatprep.mubr.msk.f32.mxu1 %vm3190_vm0, %v3189_v0 }
 0x592   : > { %v1268_v42 = vpop.f32.mrf.mxu1 }
 0x593   : > { %v1269_v53 = vadd.f32 %v1268_v42, %v1182_v52  ;;  %v1290_v42 = vrot.slane %v3527_v51, %v1289_v40 }
 0x594   : > { %v2856_v43 = vpop.f32.mrf.mxu1 }
 0x595   : > { %v1272_v54 = vadd.f32 %v1269_v53, %v3360_v5 }
 0x597   : > { %v1273_v55 = vsel %vm416_vm1, %v1272_v54, 0.0 }
 0x598   : > { %v1455_v44 = vpop.f32.mrf.mxu0 }
 0x599   : > { %1715 = vrot.lane.b32.xlu0 %v1455_v44, %s3191_s10  ;;  %2891 = vmatpush3.xpose.msk.msra.mxu0 %vm493_vm2, %v1455_v44 }
 0x59a   : > { %v2878_v45 = vpop.f32.mrf.mxu0  ;;  %v1366_v46 = vpop.f32.mrf.mxu1  ;;  %2900 = vmatprep.subr.mxu0 %v3189_v0 }
 0x59b   : > { %1713 = vrot.lane.b32.xlu1 %v1366_v46, %s3191_s10 }
 0x59c   : > { %2893 = vmatmul.mubr.msk.f32.vlgmr.msra.gmra.mxu0 %vm493_vm2, %v1366_v46  ;;  %v2867_v47 = vpop.f32.mrf.mxu1 }
 0x59d   : > { %1884 = vrot.lane.b32.xlu0 %v1455_v44, %s3196_s19  ;;  %2902 = vmatprep.mubr.msk.f32.mxu0 %vm3190_vm0, %v3189_v0 }
 0x59f   : > { %1882 = vrot.lane.b32.xlu1 %v1366_v46, %s3196_s19 }
 0x5a1   : > { %2052 = vrot.lane.b32.xlu0 %v1455_v44, %s3197_s20 }
 0x5a3   : > { %2050 = vrot.lane.b32.xlu1 %v1366_v46, %s3197_s20  ;;  %v1295_v46 = vrot.slane %v3527_v51, %v1294_v41 }
 0x5a7   : > { %1463 = vrot.lane.b32.xlu1 %v3454_v2, %s3769_s26 }
 0x5c0   : > { %1274 = vadd.xlane.f32.xlu0 %v1273_v55 }
 0x5d6   : > { %1465 = vrot.lane.b32.xlu0 %v3445_v18, %s3769_s26 }
 0x5da   : > { %1461 = vrot.lane.b32.xlu0 %v3477_v31, %s3769_s26 }
 0x60b   : > { %v1716_v56 = vpop.permute.xlu0 %1715 }
 0x60c   : > { %2901 = vmatpush3.xpose.msk.msra.mxu0 %vm493_vm2, %v1716_v56 }
 0x60d   : > { %v1714_v57 = vpop.permute.xlu1 %1713  ;;  %2910 = vmatprep.subr.mxu0 %v3189_v0 }
 0x60f   : > { %v1885_v58 = vpop.permute.xlu0 %1884  ;;  %2903 = vmatmul.mubr.msk.f32.vlgmr.msra.gmra.mxu0 %vm493_vm2, %v1714_v57 }
 0x610   : > { %2911 = vmatpush3.xpose.msk.msra.mxu0 %vm493_vm2, %v1885_v58  ;;  %2912 = vmatprep.mubr.msk.f32.mxu0 %vm3190_vm0, %v3189_v0 }
 0x611   : > { %v1883_v5 = vpop.permute.xlu1 %1882  ;;  %2920 = vmatprep.subr.mxu0 %v3189_v0 }
 0x613   : > { %v2053_v59 = vpop.permute.xlu0 %2052  ;;  %2913 = vmatmul.mubr.msk.f32.vlgmr.msra.gmra.mxu0 %vm493_vm2, %v1883_v5 }
 0x614   : > { %2921 = vmatpush3.xpose.msk.msra.mxu0 %vm493_vm2, %v2053_v59  ;;  %2922 = vmatprep.mubr.msk.f32.mxu0 %vm3190_vm0, %v3189_v0 }
 0x615   : > { %v2051_v60 = vpop.permute.xlu1 %2050  ;;  %2930 = vmatprep.subr.mxu0 %v3189_v0 }
 0x617   : > { %2923 = vmatmul.mubr.msk.f32.vlgmr.msra.gmra.mxu0 %vm493_vm2, %v2051_v60 }
 0x618   : > { %2938 = vmatprep.mubr.msk.f32.mxu0 %vm3190_vm0, %v3189_v0 }
 0x619   : > { %v1464_v8 = vpop.permute.xlu1 %1463 }
 0x649   : > { %v1275_v61 = vpop.xlane.xlu0 %1274 }
 0x64a   : > { %v1277_v62 = vmul.f32 0.03125, %v1275_v61 }
 0x64c   : > { %v1278_v63 = vsub.f32 %v1272_v54, %v1277_v62 }
 0x64d   : > { %v1466_v7 = vpop.permute.xlu0 %1465 }
 0x64e   : > { %v1279_v9 = vmul.f32 %v1278_v63, %v1278_v63  ;;  %2880 = vmatpush3.msra.mxu1 %v1466_v7 }
 0x64f   : > { %2881 = vmatprep.subr.mxu1 %v3189_v0 }
 0x650   : > { %v1280_v10 = vsel %vm416_vm1, %v1279_v9, 0.0  ;;  %2882 = vmatpush3.msra.mxu1 %v1464_v8 }
 0x651   : > { %1281 = vadd.xlane.f32.xlu1 %v1280_v10  ;;  %2883 = vmatprep.subr.mxu1 %v3189_v0  ;;  %v1462_v17 = vpop.permute.xlu0 %1461 }
 0x652   : > { %2884 = vmatpush3.msra.mxu1 %v1462_v17 }
 0x653   : > { %2885 = vmatprep.subr.mxu1 %v3189_v0 }
 0x65c   : > { %v1622_v11 = vpop.f32.mrf.mxu0 }
 0x65d   : > { %v1623_v12 = vadd.f32 %v2687_v6, %v1622_v11 }
 0x65e   : > { %v2894_v13 = vpop.f32.mrf.mxu0 }
 0x65f   : > { %v2690_v14 = vclamps-f32 %v1623_v12, 1000000.0 }
 0x661   : > { %v1628_v15 = vmul.f32 0.17677669, %v2690_v14 }
 0x662   : > { %1459 = vrot.lane.b32.xlu1 %v3461_v1, %s3769_s26 }
 0x663   : > { %v1629_v16 = vsel %vm493_vm2, %v1628_v15, -inf }
 0x664   : > { %1630 = vmax.xlane.f32.xlu0 %v1629_v16 }
 0x6cf   : > { %v1787_v3 = vpop.f32.mrf.mxu0 }
 0x6d0   : > { %v1788_v19 = vadd.f32 %v2687_v6, %v1787_v3 }
 0x6d1   : > { %v2904_v4 = vpop.f32.mrf.mxu0 }
 0x6d2   : > { %v2694_v20 = vclamps-f32 %v1788_v19, 1000000.0 }
 0x6d3   : > { %v1956_v21 = vpop.f32.mrf.mxu0 }
 0x6d4   : > { %v1793_v22 = vmul.f32 0.17677669, %v2694_v20  ;;  %v1957_v23 = vadd.f32 %v2687_v6, %v1956_v21 }
 0x6d5   : > { %v2914_v24 = vpop.f32.mrf.mxu0 }
 0x6d6   : > { %v2698_v25 = vclamps-f32 %v1957_v23, 1000000.0  ;;  %v1794_v26 = vsel %vm493_vm2, %v1793_v22, -inf }
 0x6d7   : > { %1795 = vmax.xlane.f32.xlu1 %v1794_v26  ;;  %v2124_v27 = vpop.f32.mrf.mxu0 }
 0x6d8   : > { %v1962_v28 = vmul.f32 0.17677669, %v2698_v25  ;;  %v2125_v29 = vadd.f32 %v2687_v6, %v2124_v27 }
 0x6d9   : > { %v2924_v30 = vpop.f32.mrf.mxu0 }
 0x6da   : > { %v2702_v32 = vclamps-f32 %v2125_v29, 1000000.0  ;;  %v1282_v33 = vpop.xlane.xlu1 %1281  ;;  %v1963_v34 = vsel %vm493_vm2, %v1962_v28, -inf }
 0x6db   : > { %v1283_v35 = vmul.f32 0.03125, %v1282_v33  ;;  %1964 = vmax.xlane.f32.xlu0 %v1963_v34 }
 0x6dc   : > { %v2130_v36 = vmul.f32 0.17677669, %v2702_v32 }
 0x6dd   : > { %v1284_v37 = vadd.f32 1e-05, %v1283_v35 }
 0x6de   : > { %v2131_v38 = vsel %vm493_vm2, %v2130_v36, -inf  ;;  %v1460_v39 = vpop.permute.xlu1 %1459 }
 0x6df   : > { %3072 = vrsqrt.f32 %v1284_v37  ;;  %2132 = vmax.xlane.f32.xlu0 %v2131_v38  ;;  %2886 = vmatpush3.msra.mxu1 %v1460_v39 }
 0x6e0   : > { %2895 = vmatprep.subr.mxu1 %v3189_v0 }
 0x6ec   : > { %v3073_v43 = vpop.eup %3072 }
 0x6ed   : > { %v1286_v44 = vmul.f32 %v3073_v43, %v1278_v63  ;;  %v1631_v45 = vpop.xlane.xlu0 %1630 }
 0x6ee   : > { %v1632_v47 = vsub.f32 %v1628_v15, %v1631_v45 }
 0x6ef   : > { %v1291_v48 = vmul.f32 %v1290_v42, %v1286_v44 }
 0x6f0   : > { %v1633_v52 = vmul.f32 1.442695, %v1632_v47 }
 0x6f1   : > { %v3572_v53 = vadd.f32 %v1295_v46, %v1291_v48 }
 0x6f2   : > { %3074 = vpow2.f32 %v1633_v52 }
 0x6f3   : > { %2888 = vmatmul.mubr.msk.f32.vlgmr.msra.gmra.mxu1 %vm416_vm1, %v3572_v53 }
 0x6f4   : > { %2897 = vmatprep.mubr.msk.f32.mxu1 %vm3190_vm0, %v3189_v0 }
 0x6ff   : > { %v3075_v54 = vpop.eup %3074 }
 0x700   : > { %v1635_v55 = vsel %vm493_vm2, %v3075_v54, 0.0 }
 0x701   : > { %1636 = vadd.xlane.f32.xlu1 %v1635_v55 }
 0x760   : > { %v1796_v56 = vpop.xlane.xlu1 %1795 }
 0x761   : > { %v1797_v57 = vsub.f32 %v1793_v22, %v1796_v56 }
 0x763   : > { %v1798_v58 = vmul.f32 1.442695, %v1797_v57 }
 0x764   : > { %v1965_v5 = vpop.xlane.xlu0 %1964 }
 0x765   : > { %3076 = vpow2.f32 %v1798_v58  ;;  %v1966_v59 = vsub.f32 %v1962_v28, %v1965_v5 }
 0x767   : > { %v1967_v60 = vmul.f32 1.442695, %v1966_v59  ;;  %v392_v59 = vld [vmem:[%s3758_s5 + $0x58] sm:$0xff] }
 0x768   : > { %v2133_v61 = vpop.xlane.xlu0 %2132 }
 0x769   : > { %3078 = vpow2.f32 %v1967_v60  ;;  %v2134_v62 = vsub.f32 %v2130_v36, %v2133_v61  ;;  %v390_v60 = vld [vmem:[%s3758_s5 + $0x48] sm:$0xff]  ;;  %v389_v61 = vld [vmem:[%s3758_s5 + $0x40] sm:$0xff] }
 0x76b   : > { %v2135_v63 = vmul.f32 1.442695, %v2134_v62  ;;  %v408_v62 = vld [vmem:[%s3759_s6 + $0x78] sm:$0xff] }
 0x76d   : > { %3080 = vpow2.f32 %v2135_v63  ;;  %v407_v63 = vld [vmem:[%s3759_s6 + $0x70] sm:$0xff] }
 0x772   : > { %v3077_v7 = vpop.eup %3076 }
 0x773   : > { %v1800_v8 = vsel %vm493_vm2, %v3077_v7, 0.0 }
 0x774   : > { %1801 = vadd.xlane.f32.xlu0 %v1800_v8  ;;  %v405_v8 = vld [vmem:[%s3759_s6 + $0x60] sm:$0xff] }
 0x776   : > { %v3079_v9 = vpop.eup %3078 }
 0x777   : > { %v1969_v10 = vsel %vm493_vm2, %v3079_v9, 0.0 }
 0x778   : > { %1970 = vadd.xlane.f32.xlu1 %v1969_v10  ;;  %v403_v10 = vld [vmem:[%s3759_s6 + $0x50] sm:$0xff] }
 0x77a   : > { %v3081_v6 = vpop.eup %3080 }
 0x77b   : > { %v2137_v11 = vsel %vm493_vm2, %v3081_v6, 0.0 }
 0x77c   : > { %2138 = vadd.xlane.f32.xlu0 %v2137_v11  ;;  %v401_v11 = vld [vmem:[%s3759_s6 + $0x40] sm:$0xff] }
 0x78a   : > { %v1637_v12 = vpop.xlane.xlu1 %1636 }
 0x78b   : > { %3082 = vrcp.f32 %v1637_v12  ;;  %v400_v12 = vld [vmem:[%s3759_s6 + $0x38] sm:$0xff] }
 0x798   : > { %v3083_v13 = vpop.eup %3082 }
 0x799   : > { %v1639_v15 = vmul.f32 %v3083_v13, %v3075_v54  ;;  %v399_v13 = vld [vmem:[%s3759_s6 + $0x30] sm:$0xff] }
 0x7b3   : > { %v1540_v14 = vpop.f32.mrf.mxu1 }
 0x7b4   : > { %1974 = vrot.lane.b32.xlu0 %v1540_v14, %s3196_s19  ;;  %1806 = vrot.lane.b32.xlu1 %v1540_v14, %s3191_s10  ;;  %s3771_s10 = smov 24  }
 0x7b5   : > { %2896 = vmatpush3.msra.mxu1 %v1540_v14  ;;  %v2889_v16 = vpop.f32.mrf.mxu1 }
 0x7b6   : > { %2898 = vmatmul.mubr.msk.f32.vlgmr.msra.gmra.mxu1 %vm493_vm2, %v1639_v15  ;;  %2905 = vmatprep.subr.mxu1 %v3189_v0  ;;  %v397_v15 = vld [vmem:[%s3759_s6 + $0x20] sm:$0xff]  ;;  %v396_v16 = vld [vmem:[%s3759_s6 + $0x18] sm:$0xff] }
 0x7b7   : > { %2907 = vmatprep.mubr.msk.f32.mxu1 %vm3190_vm0, %v3189_v0 }
 0x7b8   : > { %2142 = vrot.lane.b32.xlu1 %v1540_v14, %s3197_s20  ;;  %2241 = vrot.lane.b32.xlu0 %v3454_v2, %s3202_s21  ;;  %v398_v14 = vld [vmem:[%s3759_s6 + $0x28] sm:$0xff]  ;;  %s359_s20 = sand.u32 1, %s3176_s28  }
 0x7b9   : > { %s2526_s23 = scalar_lea.sflag [#allocation4], %s359_s20 }
 0x7bc   : > { %2243 = vrot.lane.b32.xlu1 %v3445_v18, %s3202_s21  ;;  %2239 = vrot.lane.b32.xlu0 %v3477_v31, %s3202_s21 }
 0x7fd   : > { %v1802_v17 = vpop.xlane.xlu0 %1801 }
 0x7fe   : > { %3084 = vrcp.f32 %v1802_v17 }
 0x801   : > { %v1971_v3 = vpop.xlane.xlu1 %1970 }
 0x802   : > { %3086 = vrcp.f32 %v1971_v3 }
 0x805   : > { %v2139_v19 = vpop.xlane.xlu0 %2138 }
 0x806   : > { %3088 = vrcp.f32 %v2139_v19 }
 0x80b   : > { %v3085_v4 = vpop.eup %3084 }
 0x80c   : > { %v1804_v21 = vmul.f32 %v3085_v4, %v3077_v7  ;;  %v406_v7 = vld [vmem:[%s3759_s6 + $0x68] sm:$0xff]  ;;  %v2340_v4 = vsub.s32 5, %v3524_v49 }
 0x80f   : > { %v3087_v22 = vpop.eup %3086 }
 0x810   : > { %v1973_v2 = vmul.f32 %v3087_v22, %v3079_v9  ;;  %v404_v9 = vld [vmem:[%s3759_s6 + $0x58] sm:$0xff] }
 0x813   : > { %v3089_v31 = vpop.eup %3088 }
 0x814   : > { %v2141_v24 = vmul.f32 %v3089_v31, %v3081_v6  ;;  %v402_v6 = vld [vmem:[%s3759_s6 + $0x48] sm:$0xff] }
 0x826   : > { %v1807_v20 = vpop.permute.xlu1 %1806  ;;  %v1975_v23 = vpop.permute.xlu0 %1974 }
 0x827   : > { %2906 = vmatpush3.msra.mxu1 %v1807_v20  ;;  %v2345_v20 = vsub.s32 6, %v3524_v49 }
 0x828   : > { %2908 = vmatmul.mubr.msk.f32.vlgmr.msra.gmra.mxu1 %vm493_vm2, %v1804_v21  ;;  %2915 = vmatprep.subr.mxu1 %v3189_v0  ;;  %v2341_v21 = vrot.slane %v3527_v51, %v2340_v4 }
 0x829   : > { %2916 = vmatpush3.msra.mxu1 %v1975_v23  ;;  %2917 = vmatprep.mubr.msk.f32.mxu1 %vm3190_vm0, %v3189_v0 }
 0x82a   : > { %v2143_v18 = vpop.permute.xlu1 %2142  ;;  %2925 = vmatprep.subr.mxu1 %v3189_v0  ;;  %v2242_v26 = vpop.permute.xlu0 %2241 }
 0x82c   : > { %2918 = vmatmul.mubr.msk.f32.vlgmr.msra.gmra.mxu1 %vm493_vm2, %v1973_v2 }
 0x82d   : > { %2926 = vmatpush3.msra.mxu1 %v2143_v18  ;;  %2927 = vmatprep.mubr.msk.f32.mxu1 %vm3190_vm0, %v3189_v0  ;;  %v2346_v18 = vrot.slane %v3527_v51, %v2345_v20 }
 0x82e   : > { %2941 = vmatprep.subr.mxu1 %v3189_v0  ;;  %v2244_v25 = vpop.permute.xlu1 %2243  ;;  %v2240_v29 = vpop.permute.xlu0 %2239 }
 0x82f   : > { %2931 = vmatpush3.msra.mxu0 %v2244_v25  ;;  %v394_v25 = vld [vmem:[%s3759_s6 + $0x8] sm:$0xff] }
 0x830   : > { %2928 = vmatmul.mubr.msk.f32.vlgmr.msra.gmra.mxu1 %vm493_vm2, %v2141_v24  ;;  %2932 = vmatprep.subr.mxu0 %v3189_v0  ;;  %v395_v24 = vld [vmem:[%s3759_s6 + $0x10] sm:$0xff] }
 0x831   : > { %2949 = vmatprep.mubr.msk.f32.mxu1 %vm3190_vm0, %v3189_v0  ;;  %2933 = vmatpush3.msra.mxu0 %v2242_v26  ;;  %v393_v26 = vld [vmem:[%s3759_s6] sm:$0xff] }
 0x832   : > { %2934 = vmatprep.subr.mxu0 %v3189_v0  ;;  %2942 = vmatpush3.msra.mxu1 %v392_v59 }
 0x833   : > { %2935 = vmatpush3.msra.mxu0 %v2240_v29  ;;  %2943 = vmatprep.subr.mxu1 %v3189_v0 }
 0x834   : > { %2936 = vmatprep.subr.mxu0 %v3189_v0 }
 0x876   : > { %v1709_v27 = vpop.f32.mrf.mxu1 }
 0x878   : > { %v2899_v28 = vpop.f32.mrf.mxu1 }
 0x8e8   : > { %v1878_v30 = vpop.f32.mrf.mxu1 }
 0x8e9   : > { %2219 = vrot.lane.b32.xlu1 %v1878_v30, %s3203_s13  ;;  %s2708_s13 = sshll.u32 %s3273_s9, 7 }
 0x8ea   : > { %v2909_v32 = vpop.f32.mrf.mxu1  ;;  %s2537_s22 = scalar_lea.hbm %s3761_s8, %s2708_s13 }
 0x8ec   : > { %v2046_v33 = vpop.f32.mrf.mxu1 }
 0x8ed   : > { %2223 = vrot.lane.b32.xlu1 %v2046_v33, %s3770_s25  ;;  %s3206_s25 = smov [#allocation5]  }
 0x8ee   : > { %v2919_v34 = vpop.f32.mrf.mxu1 }
 0x8ef   : > { %v410_v34 = vld [vmem:[#allocation2 + $0x8] sm:$0x3] }
 0x8f0   : > { %v2214_v35 = vpop.f32.mrf.mxu1 }
 0x8f1   : > { %2237 = vrot.lane.b32.xlu1 %v3461_v1, %s3202_s21  ;;  %2227 = vrot.lane.b32.xlu0 %v2214_v35, %s3771_s10  ;;  %v2235_v1 = vsub.s32 4, %v3524_v49  ;;  %v2429_v35 = vrot.slane %v410_v34, %v1181_v50  ;;  %v2516_v50 = vsub.s32 7, %v3524_v49  ;;  %s2661_s21 = sshll.u32 %s359_s20, 3  ;;  %s3124_s10 = sshll.u32 %s3206_s25, 4  ;;  %s3125_s10 = int_to_ptr.vmem [resolvable:$false] %s3124_s10 }
 0x8f2   : > { %v2929_v36 = vpop.f32.mrf.mxu1  ;;  %s361_s24 = scalar_lea.vmem [#allocation5], %s2661_s21  ;;  %s3126_s9 = scalar_lea.vmem %s3125_s10, 256 }
 0x8f3   : > { %v2236_v44 = vrot.slane %v3527_v51, %v2235_v1  ;;  %s2539_s17 = sshll.u32 %s361_s24, 4  ;;  %s2540_s17 = int_to_ptr.vmem [resolvable:$true] %s2539_s17 }
 0x8f4   : > { %s3120_s18 = scalar_lea.vmem %s2540_s17, 128  ;;  %p3127_p11 = scmp.lt.s32.totalorder %s2540_s17, %s3125_s10 }
 0x8f5   : > { %p3121_p6 = scmp.ne.s32.totalorder %s2540_s17, %s3120_s18  ;;  %p3128_p12 = scmp.lt.s32.totalorder %s3126_s9, %s3120_s18 }
 0x8f7   : > { %p3122_p9 = pnand %p3121_p6, %p3290_p5  ;;  %p3129_p13 = por %p3128_p12, %p3127_p11 }
 0x8f9   : > { %p3123_p10 = pneg %p3122_p9 }
 0x8fb   : > { %p3130_p0 = pnand %p3129_p13, %p3123_p10 }
 0x95b   : > { %v2220_v37 = vpop.permute.xlu1 %2219 }
 0x95c   : > { %v2230_v39 = vsel %vm493_vm2, %v1709_v27, %v2220_v37  ;;  %v2350_v27 = vsub.s32 0, %v3524_v49 }
 0x95e   : > { %v2351_v28 = vrot.slane %v3527_v51, %v2350_v27 }
 0x95f   : > { %v2224_v38 = vpop.permute.xlu1 %2223 }
 0x960   : > { %v2231_v40 = vsel %vm1175_vm3, %v2230_v39, %v2224_v38 }
 0x963   : > { %v2238_v41 = vpop.permute.xlu1 %2237  ;;  %v2228_v42 = vpop.permute.xlu0 %2227 }
 0x964   : > { %v2232_v43 = vsel %vm1177_vm4, %v2231_v40, %v2228_v42  ;;  %2937 = vmatpush3.msra.mxu0 %v2238_v41 }
 0x965   : > { %2939 = vmatmul.mubr.msk.f32.vlgmr.msra.gmra.mxu0 %vm416_vm1, %v2232_v43  ;;  %2952 = vmatprep.subr.mxu0 %v3189_v0 }
 0x966   : > { %2984 = vmatprep.mubr.msk.f32.mxu0 %vm3190_vm0, %v3189_v0  ;;  %2953 = vmatpush3.msra.mxu0 %v408_v62 }
 0x967   : > { %2954 = vmatprep.subr.mxu0 %v3189_v0 }
 0x968   : > { %2955 = vmatpush3.msra.mxu0 %v407_v63 }
 0x969   : > { %2956 = vmatprep.subr.mxu0 %v3189_v0 }
 0x96a   : > { %2957 = vmatpush3.msra.mxu0 %v406_v7 }
 0x96b   : > { %2958 = vmatprep.subr.mxu0 %v3189_v0 }
 0x96c   : > { %2959 = vmatpush3.msra.mxu0 %v405_v8 }
 0x96d   : > { %2960 = vmatprep.subr.mxu0 %v3189_v0 }
 0x96e   : > { %2961 = vmatpush3.msra.mxu0 %v404_v9 }
 0x96f   : > { %2962 = vmatprep.subr.mxu0 %v3189_v0 }
 0x970   : > { %2963 = vmatpush3.msra.mxu0 %v403_v10 }
 0x971   : > { %2964 = vmatprep.subr.mxu0 %v3189_v0 }
 0x972   : > { %2965 = vmatpush3.msra.mxu0 %v402_v6 }
 0x973   : > { %2966 = vmatprep.subr.mxu0 %v3189_v0 }
 0x974   : > { %2967 = vmatpush3.msra.mxu0 %v401_v11 }
 0x975   : > { %2968 = vmatprep.subr.mxu0 %v3189_v0 }
 0x976   : > { %2969 = vmatpush3.msra.mxu0 %v400_v12 }
 0x977   : > { %2970 = vmatprep.subr.mxu0 %v3189_v0 }
 0x978   : > { %2971 = vmatpush3.msra.mxu0 %v399_v13 }
 0x979   : > { %2972 = vmatprep.subr.mxu0 %v3189_v0 }
 0x97a   : > { %2973 = vmatpush3.msra.mxu0 %v398_v14 }
 0x97b   : > { %2974 = vmatprep.subr.mxu0 %v3189_v0 }
 0x97c   : > { %2975 = vmatpush3.msra.mxu0 %v397_v15 }
 0x97d   : > { %2976 = vmatprep.subr.mxu0 %v3189_v0 }
 0x97e   : > { %2977 = vmatpush3.msra.mxu0 %v396_v16 }
 0x97f   : > { %2978 = vmatprep.subr.mxu0 %v3189_v0 }
 0x980   : > { %2979 = vmatpush3.msra.mxu0 %v395_v24 }
 0x981   : > { %2980 = vmatprep.subr.mxu0 %v3189_v0 }
 0x982   : > { %2981 = vmatpush3.msra.mxu0 %v394_v25 }
 0x983   : > { %2982 = vmatprep.subr.mxu0 %v3189_v0 }
 0x984   : > { %2983 = vmatpush3.msra.mxu0 %v393_v26 }
 0xa25   : > { %v2318_v45 = vpop.f32.mrf.mxu0 }
 0xa26   : > { %v2319_v46 = vadd.f32 %v2318_v45, %v2236_v44 }
 0xa27   : > { %v2940_v47 = vpop.f32.mrf.mxu0 }
 0xa28   : > { %v2322_v48 = vadd.f32 %v2319_v46, %v3572_v53  ;;  %v391_v53 = vld [vmem:[%s3758_s5 + $0x50] sm:$0xff]  ;;  %v2517_v47 = vrot.slane %v3527_v51, %v2516_v50 }
 0xa29   : > { %2944 = vmatpush3.msra.mxu1 %v391_v53 }
 0xa2a   : > { %v2705_v52 = vclamps-f32 %v2322_v48, 1000000.0  ;;  %2945 = vmatprep.subr.mxu1 %v3189_v0 }
 0xa2b   : > { %2946 = vmatpush3.msra.mxu1 %v390_v60 }
 0xa2c   : > { %v2325_v54 = vsel %vm416_vm1, %v2705_v52, 0.0  ;;  %2947 = vmatprep.subr.mxu1 %v3189_v0 }
 0xa2d   : > { %2326 = vadd.xlane.f32.xlu0 %v2325_v54  ;;  %2948 = vmatpush3.msra.mxu1 %v389_v61 }
 0xab6   : > { %v2327_v55 = vpop.xlane.xlu0 %2326 }
 0xab7   : > { %v2328_v56 = vmul.f32 0.03125, %v2327_v55 }
 0xab9   : > { %v2329_v57 = vsub.f32 %v2705_v52, %v2328_v56  ;;  %v2522_v52 = vrot.slane %v410_v34, %v2350_v27 }
 0xabb   : > { %v2330_v58 = vmul.f32 %v2329_v57, %v2329_v57 }
 0xabd   : > { %v2331_v5 = vsel %vm416_vm1, %v2330_v58, 0.0 }
 0xabe   : > { %2332 = vadd.xlane.f32.xlu1 %v2331_v5 }
 0xb47   : > { %v2333_v17 = vpop.xlane.xlu1 %2332 }
 0xb48   : > { %v2334_v3 = vmul.f32 0.03125, %v2333_v17 }
 0xb4a   : > { %v2335_v19 = vadd.f32 1e-06, %v2334_v3 }
 0xb4c   : > { %3090 = vrsqrt.f32 %v2335_v19 }
 0xb59   : > { %v3091_v22 = vpop.eup %3090 }
 0xb5a   : > { %v2337_v23 = vmul.f32 %v3091_v22, %v2329_v57 }
 0xb5c   : > { %v2342_v2 = vmul.f32 %v2341_v21, %v2337_v23 }
 0xb5e   : > { %v2347_v31 = vadd.f32 %v2346_v18, %v2342_v2 }
 0xb60   : > { %2950 = vmatmul.mubr.msk.f32.vlgmr.msra.gmra.mxu1 %vm416_vm1, %v2347_v31 }
 0xc20   : > { %v2421_v29 = vpop.f32.mrf.mxu1 }
 0xc21   : > { %v2422_v30 = vadd.f32 %v2421_v29, %v2351_v28 }
 0xc22   : > { %v2951_v32 = vpop.f32.mrf.mxu1 }
 0xc23   : > { %v2425_v33 = vmax.f32 %v2422_v30, 0.0 }
 0xc25   : > { %2985 = vmatmul.mubr.f32.vlgmr.msra.gmra.mxu0 %v2425_v33 }
 0xce5   : > { %v2496_v36 = vpop.f32.mrf.mxu0 }
 0xce6   : > { %v2497_v37 = vadd.f32 %v2496_v36, %v2429_v35 }
 0xce7   : > { %v2986_v38 = vpop.f32.mrf.mxu0 }
 0xce8   : > { %v2500_v39 = vadd.f32 %v2497_v37, %v2347_v31 }
 0xcea   : > { %v2501_v0 = vsel %vm416_vm1, %v2500_v39, 0.0 }
 0xceb   : > { %2502 = vadd.xlane.f32.xlu0 %v2501_v0 }
 0xd74   : > { %v2503_v40 = vpop.xlane.xlu0 %2502 }
 0xd75   : > { %v2504_v41 = vmul.f32 0.03125, %v2503_v40 }
 0xd77   : > { %v2505_v42 = vsub.f32 %v2500_v39, %v2504_v41 }
 0xd79   : > { %v2506_v43 = vmul.f32 %v2505_v42, %v2505_v42 }
 0xd7b   : > { %v2507_v1 = vsel %vm416_vm1, %v2506_v43, 0.0 }
 0xd7c   : > { %2508 = vadd.xlane.f32.xlu0 %v2507_v1 }
 0xe05   : > { %v2509_v44 = vpop.xlane.xlu0 %2508 }
 0xe06   : > { %v2510_v45 = vmul.f32 0.03125, %v2509_v44 }
 0xe08   : > { %v2511_v46 = vadd.f32 1e-06, %v2510_v45 }
 0xe0a   : > { %3092 = vrsqrt.f32 %v2511_v46 }
 0xe17   : > { %v3093_v48 = vpop.eup %3092 }
 0xe18   : > { %v2513_v54 = vmul.f32 %v3093_v48, %v2505_v42 }
 0xe1a   : > { %v2518_v55 = vmul.f32 %v2517_v47, %v2513_v54 }
 0xe1c   : > { %v2523_v56 = vadd.f32 %v2522_v52, %v2518_v55 }
 0xe1e   : > { %2524 = vst.msk [vmem:[%s361_s24] sm:$0xff] %vm416_vm1, %v2523_v56 }
 0xe1f   : > { %3133 = shalt.err (!%p3130_p0)
}
 0xe20   : > { %s3134_s19 = scalar_lea.hbm %s2537_s22, 128  ;;  %s3138_s13 = scalar_lea.hbm %s3761_s8, 256 }
 0xe21   : > { %p3135_p1 = scmp.ne.s32.totalorder %s2537_s22, %s3134_s19  ;;  %p3139_p4 = scmp.lt.s32.totalorder %s2537_s22, %s3761_s8 }
 0xe22   : > { %p3140_p7 = scmp.lt.s32.totalorder %s3138_s13, %s3134_s19 }
 0xe23   : > { %p3136_p2 = pnand %p3135_p1, %p3290_p5 }
 0xe24   : > { %p3141_p8 = por %p3140_p7, %p3139_p4 }
 0xe25   : > { %p3137_p3 = pneg %p3136_p2 }
 0xe27   : > { %p3142_p6 = pnand %p3141_p8, %p3137_p3 }
 0xe29   : > { %3145 = shalt.err (!%p3142_p6)
}
 0xe2a   : > { %2991 = dma.vmem_to_hbm [thread:$0]  (%p3290_p5), %s2540_s17, 128, %s2537_s22, %s2526_s23  }
 0xe2b PF: > { %p3003_p9 = scmp.ge.s32.totalorder %s3184_s30, 2  ;;  %s2551_s26 = sand.u32 1, %s3172_s27  }
 0xe2c   : > { %p3772_p10 = scmp.ne.s32.totalorder %s3767_s16, 0  ;;  %s2552_s18 = scalar_lea.sflag [#allocation4], %s2551_s26 }
 0xe2e   : > { %p2998_p11 = pnand %p3003_p9, %p3772_p10 }
 0xe30   : > { %p2999_p12 = pneg %p2998_p11 }
 0xe32   : > { %3167 = dma.done.wait (%p2999_p12), %s2552_s18, 128  }
 0xe33   : > { %3169 = vsyncadd (%p2999_p12), %s2552_s18, 4294967168  ;;  %p19_p13 = scmp.ge.s32.totalorder %s3277_s11, 4   ;;  %s3773_s27 = smov %s3176_s28 }
 0xe34   : > { %s3774_s28 = smov %s3180_s29  ;;  %s3775_s29 = smov %s3288_s14 }
 0xe35   : > { %s3776_s30 = smov %s3277_s11  ;;  %21 = sbr.rel (!%p19_p13) target bundleno = 4 (0x4), region = 104 }
 0xe3a   :  { %2557 = vsyncpa [#allocation3], 1 }
 0xe3b   :  { %2559 = vsyncpa [#allocation3 + $0x1], 1 }
 0xe3c   :  { %2560 = vsyncpa [#allocation4], 1 }
 0xe3d   :  { %2562 = vsyncpa [#allocation4 + $0x1], 1 }

</bundles_post_ra>
